<compile_context>
chip_gen: v5e
topology: v5e:2x2
jax: 0.10.0
libtpu: 0.0.40
codegen_flags: <defaults>
</compile_context>

<pallas_src>
import functools

import jax
import jax.numpy as jnp
from jax.experimental import pallas as pl
from jax.experimental.pallas import tpu as pltpu


def _sigmoid(x):
    return 1.0 / (1.0 + jnp.exp(-x))


def _softplus(x):
    # Numerically-stable softplus built from ops that lower cleanly on Mosaic.
    return jnp.maximum(x, 0.0) + jnp.log(1.0 + jnp.exp(-jnp.abs(x)))


def transition_kernel(
    # per-timestep streamed inputs (time dim squeezed) -----------------------
    actions_ref, obs_ref, nonterm_ref, eps_p_ref, eps_q_ref,
    # initial carries (per batch tile) ---------------------------------------
    prev_state_ref, prev_belief_ref,
    # VMEM-resident weights (fused) -------------------------------------------
    w_sa_s_ref, w_sa_a_ref, b_sa_ref,          # fc_embed_state_action (split cat)
    w_gi_ref, w_gh_ref, b_gi_ref, b_ghn_ref,   # GRU (gates fused r|z|n)
    w_bp_ref, b_bp_ref, w_prior_ref, b_prior_ref,   # prior head (mean|std fused)
    w_pob_ref, w_poe_ref, b_po_ref,            # fc_embed_belief_posterior (split cat)
    w_post_ref, b_post_ref,                    # posterior head (mean|std fused)
    # outputs ------------------------------------------------------------------
    beliefs_ref, prior_states_ref, prior_means_ref, prior_stds_ref,
    post_states_ref, post_means_ref, post_stds_ref,
    # scratch carries ----------------------------------------------------------
    belief_c, state_c,
    *, min_std_dev, belief_size, state_size,
):
    t = pl.program_id(1)

    # At the first timestep of each batch tile, load the initial carries.
    @pl.when(t == 0)
    def _():
        belief_c[...] = prev_belief_ref[...].astype(jnp.float32)
        state_c[...] = prev_state_ref[...].astype(jnp.float32)

    def dot(x, w_ref):
        return jnp.dot(x, w_ref[...], preferred_element_type=jnp.float32)

    a_t = actions_ref[...].astype(jnp.float32)        # [TB, A]
    o_t = obs_ref[...].astype(jnp.float32)            # [TB, E]
    nt_t = nonterm_ref[...].astype(jnp.float32)       # [TB, 1]
    eps_p = eps_p_ref[...].astype(jnp.float32)        # [TB, S]
    eps_q = eps_q_ref[...].astype(jnp.float32)        # [TB, S]

    s = state_c[...] * nt_t                           # mask terminal transitions
    h_prev = belief_c[...]

    # hidden = relu(fc_embed_state_action(cat([state, action], 1)))
    hidden = jnp.maximum(
        dot(s, w_sa_s_ref) + dot(a_t, w_sa_a_ref) + b_sa_ref[...], 0.0)

    # GRUCell(hidden, h_prev): fused gate matmuls, PyTorch gate order r, z, n.
    #   gi = hidden @ [w_ir|w_iz|w_in] + [b_ir+b_hr | b_iz+b_hz | b_in]
    #   gh = h_prev @ [w_hr|w_hz|w_hn]
    bel = belief_size
    gi = dot(hidden, w_gi_ref) + b_gi_ref[...]        # [TB, 3*bel]
    gh = dot(h_prev, w_gh_ref)                        # [TB, 3*bel]
    r = _sigmoid(gi[:, :bel] + gh[:, :bel])
    z = _sigmoid(gi[:, bel:2 * bel] + gh[:, bel:2 * bel])
    n = jnp.tanh(gi[:, 2 * bel:] + r * (gh[:, 2 * bel:] + b_ghn_ref[...]))
    belief = (1.0 - z) * n + z * h_prev
    belief_c[...] = belief
    beliefs_ref[...] = belief.astype(beliefs_ref.dtype)

    ss = state_size

    # Prior head: single fused matmul -> [mean | raw_std].
    hp = jnp.maximum(dot(belief, w_bp_ref) + b_bp_ref[...], 0.0)
    p_out = dot(hp, w_prior_ref) + b_prior_ref[...]   # [TB, 2*S]
    p_mean = p_out[:, :ss]
    p_std = _softplus(p_out[:, ss:]) + min_std_dev
    p_state = p_mean + p_std * eps_p
    prior_means_ref[...] = p_mean.astype(prior_means_ref.dtype)
    prior_stds_ref[...] = p_std.astype(prior_stds_ref.dtype)
    prior_states_ref[...] = p_state.astype(prior_states_ref.dtype)

    # Posterior head: cat([belief, obs], 1) @ W == belief @ Wb + obs @ Wo,
    # then a single fused mean|std matmul.
    hq = jnp.maximum(
        dot(belief, w_pob_ref) + dot(o_t, w_poe_ref) + b_po_ref[...], 0.0)
    q_out = dot(hq, w_post_ref) + b_post_ref[...]     # [TB, 2*S]
    q_mean = q_out[:, :ss]
    q_std = _softplus(q_out[:, ss:]) + min_std_dev
    q_state = q_mean + q_std * eps_q
    post_means_ref[...] = q_mean.astype(post_means_ref.dtype)
    post_stds_ref[...] = q_std.astype(post_stds_ref.dtype)
    post_states_ref[...] = q_state.astype(post_states_ref.dtype)

    # Observations are provided, so the next-step carry is the posterior state.
    state_c[...] = q_state


def _fuse_weights(params):
    """Fuses the raw (PyTorch-layout-equivalent) params into the kernel layout."""
    p = params
    fused = [
        p["w_sa_s"], p["w_sa_a"], p["b_sa"],
        jnp.concatenate([p["w_ir"], p["w_iz"], p["w_in"]], axis=1),   # w_gi
        jnp.concatenate([p["w_hr"], p["w_hz"], p["w_hn"]], axis=1),   # w_gh
        jnp.concatenate([p["b_r"], p["b_z"], p["b_in"]], axis=1),     # b_gi
        p["b_hn"],                                                     # b_ghn
        p["w_bp"], p["b_bp"],
        jnp.concatenate([p["w_pm"], p["w_ps"]], axis=1),              # w_prior
        jnp.concatenate([p["b_pm"], p["b_ps"]], axis=1),              # b_prior
        p["w_pob"], p["w_poe"], p["b_po"],
        jnp.concatenate([p["w_qm"], p["w_qs"]], axis=1),              # w_post
        jnp.concatenate([p["b_qm"], p["b_qs"]], axis=1),              # b_post
    ]
    return fused


def transition_model_forward(prev_state, actions, prev_belief, observations,
                             nonterminals, noise_prior, noise_post, params,
                             *, min_std_dev=0.1, batch_tile=None):
    """Runs the whole (T-1)-step rollout in one Pallas call.

    Grid = (batch_tiles, T-1): batch is "parallel" (v7x megacore), time is
    "arbitrary" (recurrent carry in VMEM scratch).  Weights use constant
    index_maps so they stay VMEM-resident across every grid step.
    """
    Tm1, B, action_size = actions.shape
    state_size = prev_state.shape[1]
    belief_size = prev_belief.shape[1]
    embedding_size = observations.shape[2]

    TB = B if batch_tile is None else batch_tile
    assert B % TB == 0, "batch_tile must divide the batch size"
    nb = B // TB

    kernel = functools.partial(
        transition_kernel,
        min_std_dev=float(min_std_dev),
        belief_size=belief_size,
        state_size=state_size,
    )

    # Per-timestep streamed inputs: block (time-squeezed, TB, feat).
    def step_spec(feat):
        return pl.BlockSpec((None, TB, feat), lambda b, t: (t, b, 0))

    # Per-batch-tile initial carries.
    def carry_spec(feat):
        return pl.BlockSpec((TB, feat), lambda b, t: (b, 0))

    # Resident weights: whole-array block, constant index_map (no re-DMA).
    def weight_spec(arr):
        return pl.BlockSpec(arr.shape, lambda b, t: (0, 0))

    weight_arrays = _fuse_weights(params)

    in_specs = ([step_spec(action_size),      # actions
                 step_spec(embedding_size),   # observations
                 step_spec(1),                # nonterminals
                 step_spec(state_size),       # prior noise
                 step_spec(state_size),       # posterior noise
                 carry_spec(state_size),      # prev_state
                 carry_spec(belief_size)]     # prev_belief
                + [weight_spec(w) for w in weight_arrays])

    out_specs = (
        pl.BlockSpec((None, TB, belief_size), lambda b, t: (t, b, 0)),   # beliefs
        *[pl.BlockSpec((None, TB, state_size), lambda b, t: (t, b, 0))
          for _ in range(6)],                                            # prior/post
    )

    out_shape = (
        jax.ShapeDtypeStruct((Tm1, B, belief_size), jnp.float32),
        *[jax.ShapeDtypeStruct((Tm1, B, state_size), jnp.float32) for _ in range(6)],
    )

    grid_spec = pltpu.PrefetchScalarGridSpec(
        num_scalar_prefetch=0,
        grid=(nb, Tm1),
        in_specs=in_specs,
        out_specs=out_specs,
        scratch_shapes=[
            pltpu.VMEM((TB, belief_size), jnp.float32),   # belief carry
            pltpu.VMEM((TB, state_size), jnp.float32),    # state carry
        ],
    )

    outs = pl.pallas_call(
        kernel,
        out_shape=out_shape,
        grid_spec=grid_spec,
        compiler_params=pltpu.CompilerParams(
            dimension_semantics=("parallel", "arbitrary")),
    )(actions, observations, nonterminals, noise_prior, noise_post,
      prev_state, prev_belief, *weight_arrays)

    # Matches the PyTorch return order.
    return list(outs)


def init_params(key, belief_size, state_size, action_size, hidden_size,
                embedding_size):
    """Deterministic init; weights stored pre-transposed as [in, out]."""
    names_shapes_fans = [
        ("w_sa_s", (state_size, belief_size), state_size + action_size),
        ("w_sa_a", (action_size, belief_size), state_size + action_size),
        ("b_sa", (1, belief_size), state_size + action_size),
        ("w_ir", (belief_size, belief_size), belief_size),
        ("w_hr", (belief_size, belief_size), belief_size),
        ("b_r", (1, belief_size), belief_size),
        ("w_iz", (belief_size, belief_size), belief_size),
        ("w_hz", (belief_size, belief_size), belief_size),
        ("b_z", (1, belief_size), belief_size),
        ("w_in", (belief_size, belief_size), belief_size),
        ("w_hn", (belief_size, belief_size), belief_size),
        ("b_in", (1, belief_size), belief_size),
        ("b_hn", (1, belief_size), belief_size),
        ("w_bp", (belief_size, hidden_size), belief_size),
        ("b_bp", (1, hidden_size), belief_size),
        ("w_pm", (hidden_size, state_size), hidden_size),
        ("b_pm", (1, state_size), hidden_size),
        ("w_ps", (hidden_size, state_size), hidden_size),
        ("b_ps", (1, state_size), hidden_size),
        ("w_pob", (belief_size, hidden_size), belief_size + embedding_size),
        ("w_poe", (embedding_size, hidden_size), belief_size + embedding_size),
        ("b_po", (1, hidden_size), belief_size + embedding_size),
        ("w_qm", (hidden_size, state_size), hidden_size),
        ("b_qm", (1, state_size), hidden_size),
        ("w_qs", (hidden_size, state_size), hidden_size),
        ("b_qs", (1, state_size), hidden_size),
    ]
    keys = jax.random.split(key, len(names_shapes_fans))
    params = {}
    for k, (name, shape, fan_in) in zip(keys, names_shapes_fans):
        bound = 1.0 / jnp.sqrt(float(fan_in))
        params[name] = jax.random.uniform(k, shape, jnp.float32, -bound, bound)
    return params


def reference_forward(prev_state, actions, prev_belief, observations,
                      nonterminals, noise_prior, noise_post, params,
                      min_std_dev=0.1):
    """Pure-JAX reference (same math, unfused weights) for validation."""
    p = params
    Tm1 = actions.shape[0]
    belief, state = prev_belief, prev_state
    beliefs, p_states, p_means, p_stds = [], [], [], []
    q_states, q_means, q_stds = [], [], []
    for t in range(Tm1):
        s = state * nonterminals[t]
        hidden = jax.nn.relu(s @ p["w_sa_s"] + actions[t] @ p["w_sa_a"] + p["b_sa"])
        r = _sigmoid(hidden @ p["w_ir"] + belief @ p["w_hr"] + p["b_r"])
        z = _sigmoid(hidden @ p["w_iz"] + belief @ p["w_hz"] + p["b_z"])
        n = jnp.tanh(hidden @ p["w_in"] + p["b_in"]
                     + r * (belief @ p["w_hn"] + p["b_hn"]))
        belief = (1.0 - z) * n + z * belief
        hp = jax.nn.relu(belief @ p["w_bp"] + p["b_bp"])
        pm = hp @ p["w_pm"] + p["b_pm"]
        pstd = _softplus(hp @ p["w_ps"] + p["b_ps"]) + min_std_dev
        pstate = pm + pstd * noise_prior[t]
        hq = jax.nn.relu(belief @ p["w_pob"] + observations[t] @ p["w_poe"] + p["b_po"])
        qm = hq @ p["w_qm"] + p["b_qm"]
        qstd = _softplus(hq @ p["w_qs"] + p["b_qs"]) + min_std_dev
        qstate = qm + qstd * noise_post[t]
        state = qstate
        beliefs.append(belief); p_states.append(pstate); p_means.append(pm)
        p_stds.append(pstd); q_states.append(qstate); q_means.append(qm)
        q_stds.append(qstd)
    stack = lambda xs: jnp.stack(xs, axis=0)
    return [stack(beliefs), stack(p_states), stack(p_means), stack(p_stds),
            stack(q_states), stack(q_means), stack(q_stds)]


if __name__ == "__main__":
    belief_size, state_size, action_size = 32, 16, 8
    hidden_size, embedding_size = 32, 24
    T_minus_1, batch = 5, 8

    key = jax.random.PRNGKey(0)
    (k_state, k_belief, k_act, k_obs, k_nt,
     k_eps_p, k_eps_q, k_params) = jax.random.split(key, 8)

    prev_state = jax.random.normal(k_state, (batch, state_size), jnp.float32)
    prev_belief = jax.random.normal(k_belief, (batch, belief_size), jnp.float32)
    actions = jax.random.normal(k_act, (T_minus_1, batch, action_size), jnp.float32)
    observations = jax.random.normal(
        k_obs, (T_minus_1, batch, embedding_size), jnp.float32)
    nonterminals = (jax.random.uniform(k_nt, (T_minus_1, batch, 1)) > 0.1
                    ).astype(jnp.float32)
    # Gaussian noise replacing torch.randn_like (deterministic, checkable).
    noise_prior = jax.random.normal(k_eps_p, (T_minus_1, batch, state_size), jnp.float32)
    noise_post = jax.random.normal(k_eps_q, (T_minus_1, batch, state_size), jnp.float32)

    params = init_params(k_params, belief_size, state_size, action_size,
                         hidden_size, embedding_size)

    outs = transition_model_forward(prev_state, actions, prev_belief,
                                    observations, nonterminals,
                                    noise_prior, noise_post, params)
    jax.block_until_ready(outs)

    refs = reference_forward(prev_state, actions, prev_belief, observations,
                             nonterminals, noise_prior, noise_post, params)

    names = ("beliefs", "prior_states", "prior_means", "prior_std_devs",
             "posterior_states", "posterior_means", "posterior_std_devs")
    for name, got, ref in zip(names, outs, refs):
        assert got.shape == ref.shape, (name, got.shape, ref.shape)
        assert jnp.allclose(got, ref, atol=1e-4, rtol=1e-4), (
            name, float(jnp.max(jnp.abs(got - ref))))

    print("KERNEL_OK")
</pallas_src>

<mosaic_0001>
module attributes {stable_mosaic.version = 11 : i64} {
  func.func @transition_kernel(%arg0: i32, %arg1: i32, %arg2: memref<1x8x8xf32, #tpu.memory_space<vmem>>, %arg3: memref<1x8x24xf32, #tpu.memory_space<vmem>>, %arg4: memref<1x8x1xf32, #tpu.memory_space<vmem>>, %arg5: memref<1x8x16xf32, #tpu.memory_space<vmem>>, %arg6: memref<1x8x16xf32, #tpu.memory_space<vmem>>, %arg7: memref<8x16xf32, #tpu.memory_space<vmem>>, %arg8: memref<8x32xf32, #tpu.memory_space<vmem>>, %arg9: memref<16x32xf32, #tpu.memory_space<vmem>>, %arg10: memref<8x32xf32, #tpu.memory_space<vmem>>, %arg11: memref<1x32xf32, #tpu.memory_space<vmem>>, %arg12: memref<32x96xf32, #tpu.memory_space<vmem>>, %arg13: memref<32x96xf32, #tpu.memory_space<vmem>>, %arg14: memref<1x96xf32, #tpu.memory_space<vmem>>, %arg15: memref<1x32xf32, #tpu.memory_space<vmem>>, %arg16: memref<32x32xf32, #tpu.memory_space<vmem>>, %arg17: memref<1x32xf32, #tpu.memory_space<vmem>>, %arg18: memref<32x32xf32, #tpu.memory_space<vmem>>, %arg19: memref<1x32xf32, #tpu.memory_space<vmem>>, %arg20: memref<32x32xf32, #tpu.memory_space<vmem>>, %arg21: memref<24x32xf32, #tpu.memory_space<vmem>>, %arg22: memref<1x32xf32, #tpu.memory_space<vmem>>, %arg23: memref<32x32xf32, #tpu.memory_space<vmem>>, %arg24: memref<1x32xf32, #tpu.memory_space<vmem>>, %arg25: memref<1x8x32xf32, #tpu.memory_space<vmem>>, %arg26: memref<1x8x16xf32, #tpu.memory_space<vmem>>, %arg27: memref<1x8x16xf32, #tpu.memory_space<vmem>>, %arg28: memref<1x8x16xf32, #tpu.memory_space<vmem>>, %arg29: memref<1x8x16xf32, #tpu.memory_space<vmem>>, %arg30: memref<1x8x16xf32, #tpu.memory_space<vmem>>, %arg31: memref<1x8x16xf32, #tpu.memory_space<vmem>>, %arg32: memref<8x32xf32, #tpu.memory_space<vmem>>, %arg33: memref<8x16xf32, #tpu.memory_space<vmem>>) attributes {dimension_semantics = [#tpu.dimension_semantics<parallel>, #tpu.dimension_semantics<arbitrary>], iteration_bounds = array<i64: 1, 5>, scalar_prefetch = 0 : i64, scratch_operands = 2 : i64, tpu.core_type = #tpu.core_type<tc>, window_params = [{transform_indices = @transform_0, window_bounds = array<i64: 1, 8, 8>}, {transform_indices = @transform_1, window_bounds = array<i64: 1, 8, 24>}, {transform_indices = @transform_2, window_bounds = array<i64: 1, 8, 1>}, {transform_indices = @transform_3, window_bounds = array<i64: 1, 8, 16>}, {transform_indices = @transform_4, window_bounds = array<i64: 1, 8, 16>}, {transform_indices = @transform_5, window_bounds = array<i64: 8, 16>}, {transform_indices = @transform_6, window_bounds = array<i64: 8, 32>}, {pipeline_mode = #tpu.pipeline_mode<synchronous>, transform_indices = @transform_7, window_bounds = array<i64: 16, 32>}, {pipeline_mode = #tpu.pipeline_mode<synchronous>, transform_indices = @transform_8, window_bounds = array<i64: 8, 32>}, {pipeline_mode = #tpu.pipeline_mode<synchronous>, transform_indices = @transform_9, window_bounds = array<i64: 1, 32>}, {pipeline_mode = #tpu.pipeline_mode<synchronous>, transform_indices = @transform_10, window_bounds = array<i64: 32, 96>}, {pipeline_mode = #tpu.pipeline_mode<synchronous>, transform_indices = @transform_11, window_bounds = array<i64: 32, 96>}, {pipeline_mode = #tpu.pipeline_mode<synchronous>, transform_indices = @transform_12, window_bounds = array<i64: 1, 96>}, {pipeline_mode = #tpu.pipeline_mode<synchronous>, transform_indices = @transform_13, window_bounds = array<i64: 1, 32>}, {pipeline_mode = #tpu.pipeline_mode<synchronous>, transform_indices = @transform_14, window_bounds = array<i64: 32, 32>}, {pipeline_mode = #tpu.pipeline_mode<synchronous>, transform_indices = @transform_15, window_bounds = array<i64: 1, 32>}, {pipeline_mode = #tpu.pipeline_mode<synchronous>, transform_indices = @transform_16, window_bounds = array<i64: 32, 32>}, {pipeline_mode = #tpu.pipeline_mode<synchronous>, transform_indices = @transform_17, window_bounds = array<i64: 1, 32>}, {pipeline_mode = #tpu.pipeline_mode<synchronous>, transform_indices = @transform_18, window_bounds = array<i64: 32, 32>}, {pipeline_mode = #tpu.pipeline_mode<synchronous>, transform_indices = @transform_19, window_bounds = array<i64: 24, 32>}, {pipeline_mode = #tpu.pipeline_mode<synchronous>, transform_indices = @transform_20, window_bounds = array<i64: 1, 32>}, {pipeline_mode = #tpu.pipeline_mode<synchronous>, transform_indices = @transform_21, window_bounds = array<i64: 32, 32>}, {pipeline_mode = #tpu.pipeline_mode<synchronous>, transform_indices = @transform_22, window_bounds = array<i64: 1, 32>}, {transform_indices = @transform_23, window_bounds = array<i64: 1, 8, 32>}, {transform_indices = @transform_24, window_bounds = array<i64: 1, 8, 16>}, {transform_indices = @transform_25, window_bounds = array<i64: 1, 8, 16>}, {transform_indices = @transform_26, window_bounds = array<i64: 1, 8, 16>}, {transform_indices = @transform_27, window_bounds = array<i64: 1, 8, 16>}, {transform_indices = @transform_28, window_bounds = array<i64: 1, 8, 16>}, {transform_indices = @transform_29, window_bounds = array<i64: 1, 8, 16>}]} {
    %c0_i32 = arith.constant 0 : i32
    %0 = arith.cmpi eq, %arg1, %c0_i32 : i32
    %1 = arith.extui %0 : i1 to i32
    %c0_i32_0 = arith.constant 0 : i32
    %2 = arith.cmpi ne, %1, %c0_i32_0 : i32
    scf.if %2 {
      %c0_102 = arith.constant 0 : index
      %c0_103 = arith.constant 0 : index
      %149 = vector.load %arg8[%c0_102, %c0_103] : memref<8x32xf32, #tpu.memory_space<vmem>>, vector<8x32xf32>
      %c0_104 = arith.constant 0 : index
      %c0_105 = arith.constant 0 : index
      %150 = vector.load %arg32[%c0_104, %c0_105] : memref<8x32xf32, #tpu.memory_space<vmem>>, vector<8x32xf32>
      tpu.vector_store %arg32[%c0_104, %c0_105], %149 {strides = array<i32>} : memref<8x32xf32, #tpu.memory_space<vmem>>, vector<8x32xf32>,
      %c0_106 = arith.constant 0 : index
      %c0_107 = arith.constant 0 : index
      %151 = vector.load %arg7[%c0_106, %c0_107] : memref<8x16xf32, #tpu.memory_space<vmem>>, vector<8x16xf32>
      %c0_108 = arith.constant 0 : index
      %c0_109 = arith.constant 0 : index
      %152 = vector.load %arg33[%c0_108, %c0_109] : memref<8x16xf32, #tpu.memory_space<vmem>>, vector<8x16xf32>
      tpu.vector_store %arg33[%c0_108, %c0_109], %151 {strides = array<i32>} : memref<8x16xf32, #tpu.memory_space<vmem>>, vector<8x16xf32>,
    } else {
    }
    %c0 = arith.constant 0 : index
    %c0_1 = arith.constant 0 : index
    %c0_2 = arith.constant 0 : index
    %3 = vector.load %arg2[%c0, %c0_1, %c0_2] : memref<1x8x8xf32, #tpu.memory_space<vmem>>, vector<1x8x8xf32>
    %4 = vector.shape_cast %3 : vector<1x8x8xf32> to vector<8x8xf32>
    %c0_3 = arith.constant 0 : index
    %c0_4 = arith.constant 0 : index
    %c0_5 = arith.constant 0 : index
    %5 = vector.load %arg3[%c0_3, %c0_4, %c0_5] : memref<1x8x24xf32, #tpu.memory_space<vmem>>, vector<1x8x24xf32>
    %6 = vector.shape_cast %5 : vector<1x8x24xf32> to vector<8x24xf32>
    %c0_6 = arith.constant 0 : index
    %c0_7 = arith.constant 0 : index
    %c0_8 = arith.constant 0 : index
    %7 = vector.load %arg4[%c0_6, %c0_7, %c0_8] : memref<1x8x1xf32, #tpu.memory_space<vmem>>, vector<1x8x1xf32>
    %8 = vector.shape_cast %7 : vector<1x8x1xf32> to vector<8x1xf32>
    %c0_9 = arith.constant 0 : index
    %c0_10 = arith.constant 0 : index
    %c0_11 = arith.constant 0 : index
    %9 = vector.load %arg5[%c0_9, %c0_10, %c0_11] : memref<1x8x16xf32, #tpu.memory_space<vmem>>, vector<1x8x16xf32>
    %10 = vector.shape_cast %9 : vector<1x8x16xf32> to vector<8x16xf32>
    %c0_12 = arith.constant 0 : index
    %c0_13 = arith.constant 0 : index
    %c0_14 = arith.constant 0 : index
    %11 = vector.load %arg6[%c0_12, %c0_13, %c0_14] : memref<1x8x16xf32, #tpu.memory_space<vmem>>, vector<1x8x16xf32>
    %12 = vector.shape_cast %11 : vector<1x8x16xf32> to vector<8x16xf32>
    %c0_15 = arith.constant 0 : index
    %c0_16 = arith.constant 0 : index
    %13 = vector.load %arg33[%c0_15, %c0_16] : memref<8x16xf32, #tpu.memory_space<vmem>>, vector<8x16xf32>
    %14 = vector.broadcast %8 : vector<8x1xf32> to vector<8x16xf32>
    %15 = arith.mulf %13, %14 : vector<8x16xf32>
    %c0_17 = arith.constant 0 : index
    %c0_18 = arith.constant 0 : index
    %16 = vector.load %arg32[%c0_17, %c0_18] : memref<8x32xf32, #tpu.memory_space<vmem>>, vector<8x32xf32>
    %c0_19 = arith.constant 0 : index
    %c0_20 = arith.constant 0 : index
    %17 = vector.load %arg9[%c0_19, %c0_20] : memref<16x32xf32, #tpu.memory_space<vmem>>, vector<16x32xf32>
    %cst = arith.constant dense<0.000000e+00> : vector<8x32xf32>
    %18 = tpu.matmul %15, %17, %cst {dimension_numbers = #tpu.dot_dimension_numbers<[1], [0], [0], [1], [0, 0, 1, 1], [], []>} : vector<8x16xf32>, vector<16x32xf32>, vector<8x32xf32> -> vector<8x32xf32>
    %c0_21 = arith.constant 0 : index
    %c0_22 = arith.constant 0 : index
    %19 = vector.load %arg10[%c0_21, %c0_22] : memref<8x32xf32, #tpu.memory_space<vmem>>, vector<8x32xf32>
    %cst_23 = arith.constant dense<0.000000e+00> : vector<8x32xf32>
    %20 = tpu.matmul %4, %19, %cst_23 {dimension_numbers = #tpu.dot_dimension_numbers<[1], [0], [0], [1], [0, 0, 1, 1], [], []>} : vector<8x8xf32>, vector<8x32xf32>, vector<8x32xf32> -> vector<8x32xf32>
    %21 = arith.addf %18, %20 : vector<8x32xf32>
    %c0_24 = arith.constant 0 : index
    %c0_25 = arith.constant 0 : index
    %22 = vector.load %arg11[%c0_24, %c0_25] : memref<1x32xf32, #tpu.memory_space<vmem>>, vector<1x32xf32>
    %23 = vector.broadcast %22 : vector<1x32xf32> to vector<8x32xf32>
    %24 = arith.addf %21, %23 : vector<8x32xf32>
    %cst_26 = arith.constant 0.000000e+00 : f32
    %25 = vector.broadcast %cst_26 : f32 to vector<8x32xf32>
    %26 = arith.maximumf %24, %25 : vector<8x32xf32>
    %c0_27 = arith.constant 0 : index
    %c0_28 = arith.constant 0 : index
    %27 = vector.load %arg12[%c0_27, %c0_28] : memref<32x96xf32, #tpu.memory_space<vmem>>, vector<32x96xf32>
    %cst_29 = arith.constant dense<0.000000e+00> : vector<8x96xf32>
    %28 = tpu.matmul %26, %27, %cst_29 {dimension_numbers = #tpu.dot_dimension_numbers<[1], [0], [0], [1], [0, 0, 1, 1], [], []>} : vector<8x32xf32>, vector<32x96xf32>, vector<8x96xf32> -> vector<8x96xf32>
    %c0_30 = arith.constant 0 : index
    %c0_31 = arith.constant 0 : index
    %29 = vector.load %arg14[%c0_30, %c0_31] : memref<1x96xf32, #tpu.memory_space<vmem>>, vector<1x96xf32>
    %30 = vector.broadcast %29 : vector<1x96xf32> to vector<8x96xf32>
    %31 = arith.addf %28, %30 : vector<8x96xf32>
    %c0_32 = arith.constant 0 : index
    %c0_33 = arith.constant 0 : index
    %32 = vector.load %arg13[%c0_32, %c0_33] : memref<32x96xf32, #tpu.memory_space<vmem>>, vector<32x96xf32>
    %cst_34 = arith.constant dense<0.000000e+00> : vector<8x96xf32>
    %33 = tpu.matmul %16, %32, %cst_34 {dimension_numbers = #tpu.dot_dimension_numbers<[1], [0], [0], [1], [0, 0, 1, 1], [], []>} : vector<8x32xf32>, vector<32x96xf32>, vector<8x96xf32> -> vector<8x96xf32>
    %34 = vector.extract_strided_slice %31 {offsets = [0, 0], sizes = [8, 32], strides = [1, 1]} : vector<8x96xf32> to vector<8x32xf32>
    %35 = vector.extract_strided_slice %33 {offsets = [0, 0], sizes = [8, 32], strides = [1, 1]} : vector<8x96xf32> to vector<8x32xf32>
    %36 = arith.addf %34, %35 : vector<8x32xf32>
    %cst_35 = arith.constant 0.000000e+00 : f32
    %37 = vector.broadcast %cst_35 : f32 to vector<8x32xf32>
    %38 = arith.subf %37, %36 : vector<8x32xf32>
    %39 = math.exp %38 : vector<8x32xf32>
    %cst_36 = arith.constant 1.000000e+00 : f32
    %40 = vector.broadcast %cst_36 : f32 to vector<8x32xf32>
    %41 = arith.addf %40, %39 : vector<8x32xf32>
    %cst_37 = arith.constant 1.000000e+00 : f32
    %42 = vector.broadcast %cst_37 : f32 to vector<8x32xf32>
    %43 = arith.divf %42, %41 : vector<8x32xf32>
    %44 = vector.extract_strided_slice %31 {offsets = [0, 32], sizes = [8, 32], strides = [1, 1]} : vector<8x96xf32> to vector<8x32xf32>
    %45 = vector.extract_strided_slice %33 {offsets = [0, 32], sizes = [8, 32], strides = [1, 1]} : vector<8x96xf32> to vector<8x32xf32>
    %46 = arith.addf %44, %45 : vector<8x32xf32>
    %cst_38 = arith.constant 0.000000e+00 : f32
    %47 = vector.broadcast %cst_38 : f32 to vector<8x32xf32>
    %48 = arith.subf %47, %46 : vector<8x32xf32>
    %49 = math.exp %48 : vector<8x32xf32>
    %cst_39 = arith.constant 1.000000e+00 : f32
    %50 = vector.broadcast %cst_39 : f32 to vector<8x32xf32>
    %51 = arith.addf %50, %49 : vector<8x32xf32>
    %cst_40 = arith.constant 1.000000e+00 : f32
    %52 = vector.broadcast %cst_40 : f32 to vector<8x32xf32>
    %53 = arith.divf %52, %51 : vector<8x32xf32>
    %54 = vector.extract_strided_slice %31 {offsets = [0, 64], sizes = [8, 32], strides = [1, 1]} : vector<8x96xf32> to vector<8x32xf32>
    %55 = vector.extract_strided_slice %33 {offsets = [0, 64], sizes = [8, 32], strides = [1, 1]} : vector<8x96xf32> to vector<8x32xf32>
    %c0_41 = arith.constant 0 : index
    %c0_42 = arith.constant 0 : index
    %56 = vector.load %arg15[%c0_41, %c0_42] : memref<1x32xf32, #tpu.memory_space<vmem>>, vector<1x32xf32>
    %57 = vector.broadcast %56 : vector<1x32xf32> to vector<8x32xf32>
    %58 = arith.addf %55, %57 : vector<8x32xf32>
    %59 = arith.mulf %43, %58 : vector<8x32xf32>
    %60 = arith.addf %54, %59 : vector<8x32xf32>
    %61 = math.tanh %60 : vector<8x32xf32>
    %cst_43 = arith.constant 1.000000e+00 : f32
    %62 = vector.broadcast %cst_43 : f32 to vector<8x32xf32>
    %63 = arith.subf %62, %53 : vector<8x32xf32>
    %64 = arith.mulf %63, %61 : vector<8x32xf32>
    %65 = arith.mulf %53, %16 : vector<8x32xf32>
    %66 = arith.addf %64, %65 : vector<8x32xf32>
    %c0_44 = arith.constant 0 : index
    %c0_45 = arith.constant 0 : index
    %67 = vector.load %arg32[%c0_44, %c0_45] : memref<8x32xf32, #tpu.memory_space<vmem>>, vector<8x32xf32>
    tpu.vector_store %arg32[%c0_44, %c0_45], %66 {strides = array<i32>} : memref<8x32xf32, #tpu.memory_space<vmem>>, vector<8x32xf32>,
    %c0_46 = arith.constant 0 : index
    %c0_47 = arith.constant 0 : index
    %c0_48 = arith.constant 0 : index
    %68 = vector.load %arg25[%c0_46, %c0_47, %c0_48] : memref<1x8x32xf32, #tpu.memory_space<vmem>>, vector<1x8x32xf32>
    %69 = vector.shape_cast %68 : vector<1x8x32xf32> to vector<8x32xf32>
    %70 = vector.shape_cast %66 : vector<8x32xf32> to vector<1x8x32xf32>
    tpu.vector_store %arg25[%c0_46, %c0_47, %c0_48], %70 {strides = array<i32>} : memref<1x8x32xf32, #tpu.memory_space<vmem>>, vector<1x8x32xf32>,
    %c0_49 = arith.constant 0 : index
    %c0_50 = arith.constant 0 : index
    %71 = vector.load %arg16[%c0_49, %c0_50] : memref<32x32xf32, #tpu.memory_space<vmem>>, vector<32x32xf32>
    %cst_51 = arith.constant dense<0.000000e+00> : vector<8x32xf32>
    %72 = tpu.matmul %66, %71, %cst_51 {dimension_numbers = #tpu.dot_dimension_numbers<[1], [0], [0], [1], [0, 0, 1, 1], [], []>} : vector<8x32xf32>, vector<32x32xf32>, vector<8x32xf32> -> vector<8x32xf32>
    %c0_52 = arith.constant 0 : index
    %c0_53 = arith.constant 0 : index
    %73 = vector.load %arg17[%c0_52, %c0_53] : memref<1x32xf32, #tpu.memory_space<vmem>>, vector<1x32xf32>
    %74 = vector.broadcast %73 : vector<1x32xf32> to vector<8x32xf32>
    %75 = arith.addf %72, %74 : vector<8x32xf32>
    %cst_54 = arith.constant 0.000000e+00 : f32
    %76 = vector.broadcast %cst_54 : f32 to vector<8x32xf32>
    %77 = arith.maximumf %75, %76 : vector<8x32xf32>
    %c0_55 = arith.constant 0 : index
    %c0_56 = arith.constant 0 : index
    %78 = vector.load %arg18[%c0_55, %c0_56] : memref<32x32xf32, #tpu.memory_space<vmem>>, vector<32x32xf32>
    %cst_57 = arith.constant dense<0.000000e+00> : vector<8x32xf32>
    %79 = tpu.matmul %77, %78, %cst_57 {dimension_numbers = #tpu.dot_dimension_numbers<[1], [0], [0], [1], [0, 0, 1, 1], [], []>} : vector<8x32xf32>, vector<32x32xf32>, vector<8x32xf32> -> vector<8x32xf32>
    %c0_58 = arith.constant 0 : index
    %c0_59 = arith.constant 0 : index
    %80 = vector.load %arg19[%c0_58, %c0_59] : memref<1x32xf32, #tpu.memory_space<vmem>>, vector<1x32xf32>
    %81 = vector.broadcast %80 : vector<1x32xf32> to vector<8x32xf32>
    %82 = arith.addf %79, %81 : vector<8x32xf32>
    %83 = vector.extract_strided_slice %82 {offsets = [0, 0], sizes = [8, 16], strides = [1, 1]} : vector<8x32xf32> to vector<8x16xf32>
    %84 = vector.extract_strided_slice %82 {offsets = [0, 16], sizes = [8, 16], strides = [1, 1]} : vector<8x32xf32> to vector<8x16xf32>
    %cst_60 = arith.constant 0.000000e+00 : f32
    %85 = vector.broadcast %cst_60 : f32 to vector<8x16xf32>
    %86 = arith.maximumf %84, %85 : vector<8x16xf32>
    %87 = math.absf %84 : vector<8x16xf32>
    %cst_61 = arith.constant 0.000000e+00 : f32
    %88 = vector.broadcast %cst_61 : f32 to vector<8x16xf32>
    %89 = arith.subf %88, %87 : vector<8x16xf32>
    %90 = math.exp %89 : vector<8x16xf32>
    %cst_62 = arith.constant 1.000000e+00 : f32
    %91 = vector.broadcast %cst_62 : f32 to vector<8x16xf32>
    %92 = arith.addf %91, %90 : vector<8x16xf32>
    %93 = math.log %92 : vector<8x16xf32>
    %94 = arith.addf %86, %93 : vector<8x16xf32>
    %cst_63 = arith.constant 1.000000e-01 : f32
    %95 = vector.broadcast %cst_63 : f32 to vector<8x16xf32>
    %96 = arith.addf %94, %95 : vector<8x16xf32>
    %97 = arith.mulf %96, %10 : vector<8x16xf32>
    %98 = arith.addf %83, %97 : vector<8x16xf32>
    %c0_64 = arith.constant 0 : index
    %c0_65 = arith.constant 0 : index
    %c0_66 = arith.constant 0 : index
    %99 = vector.load %arg27[%c0_64, %c0_65, %c0_66] : memref<1x8x16xf32, #tpu.memory_space<vmem>>, vector<1x8x16xf32>
    %100 = vector.shape_cast %99 : vector<1x8x16xf32> to vector<8x16xf32>
    %101 = vector.shape_cast %83 : vector<8x16xf32> to vector<1x8x16xf32>
    tpu.vector_store %arg27[%c0_64, %c0_65, %c0_66], %101 {strides = array<i32>} : memref<1x8x16xf32, #tpu.memory_space<vmem>>, vector<1x8x16xf32>,
    %c0_67 = arith.constant 0 : index
    %c0_68 = arith.constant 0 : index
    %c0_69 = arith.constant 0 : index
    %102 = vector.load %arg28[%c0_67, %c0_68, %c0_69] : memref<1x8x16xf32, #tpu.memory_space<vmem>>, vector<1x8x16xf32>
    %103 = vector.shape_cast %102 : vector<1x8x16xf32> to vector<8x16xf32>
    %104 = vector.shape_cast %96 : vector<8x16xf32> to vector<1x8x16xf32>
    tpu.vector_store %arg28[%c0_67, %c0_68, %c0_69], %104 {strides = array<i32>} : memref<1x8x16xf32, #tpu.memory_space<vmem>>, vector<1x8x16xf32>,
    %c0_70 = arith.constant 0 : index
    %c0_71 = arith.constant 0 : index
    %c0_72 = arith.constant 0 : index
    %105 = vector.load %arg26[%c0_70, %c0_71, %c0_72] : memref<1x8x16xf32, #tpu.memory_space<vmem>>, vector<1x8x16xf32>
    %106 = vector.shape_cast %105 : vector<1x8x16xf32> to vector<8x16xf32>
    %107 = vector.shape_cast %98 : vector<8x16xf32> to vector<1x8x16xf32>
    tpu.vector_store %arg26[%c0_70, %c0_71, %c0_72], %107 {strides = array<i32>} : memref<1x8x16xf32, #tpu.memory_space<vmem>>, vector<1x8x16xf32>,
    %c0_73 = arith.constant 0 : index
    %c0_74 = arith.constant 0 : index
    %108 = vector.load %arg20[%c0_73, %c0_74] : memref<32x32xf32, #tpu.memory_space<vmem>>, vector<32x32xf32>
    %cst_75 = arith.constant dense<0.000000e+00> : vector<8x32xf32>
    %109 = tpu.matmul %66, %108, %cst_75 {dimension_numbers = #tpu.dot_dimension_numbers<[1], [0], [0], [1], [0, 0, 1, 1], [], []>} : vector<8x32xf32>, vector<32x32xf32>, vector<8x32xf32> -> vector<8x32xf32>
    %c0_76 = arith.constant 0 : index
    %c0_77 = arith.constant 0 : index
    %110 = vector.load %arg21[%c0_76, %c0_77] : memref<24x32xf32, #tpu.memory_space<vmem>>, vector<24x32xf32>
    %cst_78 = arith.constant dense<0.000000e+00> : vector<8x32xf32>
    %111 = tpu.matmul %6, %110, %cst_78 {dimension_numbers = #tpu.dot_dimension_numbers<[1], [0], [0], [1], [0, 0, 1, 1], [], []>} : vector<8x24xf32>, vector<24x32xf32>, vector<8x32xf32> -> vector<8x32xf32>
    %112 = arith.addf %109, %111 : vector<8x32xf32>
    %c0_79 = arith.constant 0 : index
    %c0_80 = arith.constant 0 : index
    %113 = vector.load %arg22[%c0_79, %c0_80] : memref<1x32xf32, #tpu.memory_space<vmem>>, vector<1x32xf32>
    %114 = vector.broadcast %113 : vector<1x32xf32> to vector<8x32xf32>
    %115 = arith.addf %112, %114 : vector<8x32xf32>
    %cst_81 = arith.constant 0.000000e+00 : f32
    %116 = vector.broadcast %cst_81 : f32 to vector<8x32xf32>
    %117 = arith.maximumf %115, %116 : vector<8x32xf32>
    %c0_82 = arith.constant 0 : index
    %c0_83 = arith.constant 0 : index
    %118 = vector.load %arg23[%c0_82, %c0_83] : memref<32x32xf32, #tpu.memory_space<vmem>>, vector<32x32xf32>
    %cst_84 = arith.constant dense<0.000000e+00> : vector<8x32xf32>
    %119 = tpu.matmul %117, %118, %cst_84 {dimension_numbers = #tpu.dot_dimension_numbers<[1], [0], [0], [1], [0, 0, 1, 1], [], []>} : vector<8x32xf32>, vector<32x32xf32>, vector<8x32xf32> -> vector<8x32xf32>
    %c0_85 = arith.constant 0 : index
    %c0_86 = arith.constant 0 : index
    %120 = vector.load %arg24[%c0_85, %c0_86] : memref<1x32xf32, #tpu.memory_space<vmem>>, vector<1x32xf32>
    %121 = vector.broadcast %120 : vector<1x32xf32> to vector<8x32xf32>
    %122 = arith.addf %119, %121 : vector<8x32xf32>
    %123 = vector.extract_strided_slice %122 {offsets = [0, 0], sizes = [8, 16], strides = [1, 1]} : vector<8x32xf32> to vector<8x16xf32>
    %124 = vector.extract_strided_slice %122 {offsets = [0, 16], sizes = [8, 16], strides = [1, 1]} : vector<8x32xf32> to vector<8x16xf32>
    %cst_87 = arith.constant 0.000000e+00 : f32
    %125 = vector.broadcast %cst_87 : f32 to vector<8x16xf32>
    %126 = arith.maximumf %124, %125 : vector<8x16xf32>
    %127 = math.absf %124 : vector<8x16xf32>
    %cst_88 = arith.constant 0.000000e+00 : f32
    %128 = vector.broadcast %cst_88 : f32 to vector<8x16xf32>
    %129 = arith.subf %128, %127 : vector<8x16xf32>
    %130 = math.exp %129 : vector<8x16xf32>
    %cst_89 = arith.constant 1.000000e+00 : f32
    %131 = vector.broadcast %cst_89 : f32 to vector<8x16xf32>
    %132 = arith.addf %131, %130 : vector<8x16xf32>
    %133 = math.log %132 : vector<8x16xf32>
    %134 = arith.addf %126, %133 : vector<8x16xf32>
    %cst_90 = arith.constant 1.000000e-01 : f32
    %135 = vector.broadcast %cst_90 : f32 to vector<8x16xf32>
    %136 = arith.addf %134, %135 : vector<8x16xf32>
    %137 = arith.mulf %136, %12 : vector<8x16xf32>
    %138 = arith.addf %123, %137 : vector<8x16xf32>
    %c0_91 = arith.constant 0 : index
    %c0_92 = arith.constant 0 : index
    %c0_93 = arith.constant 0 : index
    %139 = vector.load %arg30[%c0_91, %c0_92, %c0_93] : memref<1x8x16xf32, #tpu.memory_space<vmem>>, vector<1x8x16xf32>
    %140 = vector.shape_cast %139 : vector<1x8x16xf32> to vector<8x16xf32>
    %141 = vector.shape_cast %123 : vector<8x16xf32> to vector<1x8x16xf32>
    tpu.vector_store %arg30[%c0_91, %c0_92, %c0_93], %141 {strides = array<i32>} : memref<1x8x16xf32, #tpu.memory_space<vmem>>, vector<1x8x16xf32>,
    %c0_94 = arith.constant 0 : index
    %c0_95 = arith.constant 0 : index
    %c0_96 = arith.constant 0 : index
    %142 = vector.load %arg31[%c0_94, %c0_95, %c0_96] : memref<1x8x16xf32, #tpu.memory_space<vmem>>, vector<1x8x16xf32>
    %143 = vector.shape_cast %142 : vector<1x8x16xf32> to vector<8x16xf32>
    %144 = vector.shape_cast %136 : vector<8x16xf32> to vector<1x8x16xf32>
    tpu.vector_store %arg31[%c0_94, %c0_95, %c0_96], %144 {strides = array<i32>} : memref<1x8x16xf32, #tpu.memory_space<vmem>>, vector<1x8x16xf32>,
    %c0_97 = arith.constant 0 : index
    %c0_98 = arith.constant 0 : index
    %c0_99 = arith.constant 0 : index
    %145 = vector.load %arg29[%c0_97, %c0_98, %c0_99] : memref<1x8x16xf32, #tpu.memory_space<vmem>>, vector<1x8x16xf32>
    %146 = vector.shape_cast %145 : vector<1x8x16xf32> to vector<8x16xf32>
    %147 = vector.shape_cast %138 : vector<8x16xf32> to vector<1x8x16xf32>
    tpu.vector_store %arg29[%c0_97, %c0_98, %c0_99], %147 {strides = array<i32>} : memref<1x8x16xf32, #tpu.memory_space<vmem>>, vector<1x8x16xf32>,
    %c0_100 = arith.constant 0 : index
    %c0_101 = arith.constant 0 : index
    %148 = vector.load %arg33[%c0_100, %c0_101] : memref<8x16xf32, #tpu.memory_space<vmem>>, vector<8x16xf32>
    tpu.vector_store %arg33[%c0_100, %c0_101], %138 {strides = array<i32>} : memref<8x16xf32, #tpu.memory_space<vmem>>, vector<8x16xf32>,
    return
  }
  func.func @transform_0(%arg0: i32, %arg1: i32) -> (i32, i32, i32) {
    %c0_i32 = arith.constant 0 : i32
    %c0_i32_0 = arith.constant 0 : i32
    return %arg1, %arg0, %c0_i32 : i32, i32, i32
  }
  func.func @transform_1(%arg0: i32, %arg1: i32) -> (i32, i32, i32) {
    %c0_i32 = arith.constant 0 : i32
    %c0_i32_0 = arith.constant 0 : i32
    return %arg1, %arg0, %c0_i32 : i32, i32, i32
  }
  func.func @transform_2(%arg0: i32, %arg1: i32) -> (i32, i32, i32) {
    %c0_i32 = arith.constant 0 : i32
    %c0_i32_0 = arith.constant 0 : i32
    return %arg1, %arg0, %c0_i32 : i32, i32, i32
  }
  func.func @transform_3(%arg0: i32, %arg1: i32) -> (i32, i32, i32) {
    %c0_i32 = arith.constant 0 : i32
    %c0_i32_0 = arith.constant 0 : i32
    return %arg1, %arg0, %c0_i32 : i32, i32, i32
  }
  func.func @transform_4(%arg0: i32, %arg1: i32) -> (i32, i32, i32) {
    %c0_i32 = arith.constant 0 : i32
    %c0_i32_0 = arith.constant 0 : i32
    return %arg1, %arg0, %c0_i32 : i32, i32, i32
  }
  func.func @transform_5(%arg0: i32, %arg1: i32) -> (i32, i32) {
    %c0_i32 = arith.constant 0 : i32
    %c0_i32_0 = arith.constant 0 : i32
    return %arg0, %c0_i32 : i32, i32
  }
  func.func @transform_6(%arg0: i32, %arg1: i32) -> (i32, i32) {
    %c0_i32 = arith.constant 0 : i32
    %c0_i32_0 = arith.constant 0 : i32
    return %arg0, %c0_i32 : i32, i32
  }
  func.func @transform_7(%arg0: i32, %arg1: i32) -> (i32, i32) {
    %c0_i32 = arith.constant 0 : i32
    %c0_i32_0 = arith.constant 0 : i32
    %c0_i32_1 = arith.constant 0 : i32
    return %c0_i32, %c0_i32_0 : i32, i32
  }
  func.func @transform_8(%arg0: i32, %arg1: i32) -> (i32, i32) {
    %c0_i32 = arith.constant 0 : i32
    %c0_i32_0 = arith.constant 0 : i32
    %c0_i32_1 = arith.constant 0 : i32
    return %c0_i32, %c0_i32_0 : i32, i32
  }
  func.func @transform_9(%arg0: i32, %arg1: i32) -> (i32, i32) {
    %c0_i32 = arith.constant 0 : i32
    %c0_i32_0 = arith.constant 0 : i32
    %c0_i32_1 = arith.constant 0 : i32
    return %c0_i32, %c0_i32_0 : i32, i32
  }
  func.func @transform_10(%arg0: i32, %arg1: i32) -> (i32, i32) {
    %c0_i32 = arith.constant 0 : i32
    %c0_i32_0 = arith.constant 0 : i32
    %c0_i32_1 = arith.constant 0 : i32
    return %c0_i32, %c0_i32_0 : i32, i32
  }
  func.func @transform_11(%arg0: i32, %arg1: i32) -> (i32, i32) {
    %c0_i32 = arith.constant 0 : i32
    %c0_i32_0 = arith.constant 0 : i32
    %c0_i32_1 = arith.constant 0 : i32
    return %c0_i32, %c0_i32_0 : i32, i32
  }
  func.func @transform_12(%arg0: i32, %arg1: i32) -> (i32, i32) {
    %c0_i32 = arith.constant 0 : i32
    %c0_i32_0 = arith.constant 0 : i32
    %c0_i32_1 = arith.constant 0 : i32
    return %c0_i32, %c0_i32_0 : i32, i32
  }
  func.func @transform_13(%arg0: i32, %arg1: i32) -> (i32, i32) {
    %c0_i32 = arith.constant 0 : i32
    %c0_i32_0 = arith.constant 0 : i32
    %c0_i32_1 = arith.constant 0 : i32
    return %c0_i32, %c0_i32_0 : i32, i32
  }
  func.func @transform_14(%arg0: i32, %arg1: i32) -> (i32, i32) {
    %c0_i32 = arith.constant 0 : i32
    %c0_i32_0 = arith.constant 0 : i32
    %c0_i32_1 = arith.constant 0 : i32
    return %c0_i32, %c0_i32_0 : i32, i32
  }
  func.func @transform_15(%arg0: i32, %arg1: i32) -> (i32, i32) {
    %c0_i32 = arith.constant 0 : i32
    %c0_i32_0 = arith.constant 0 : i32
    %c0_i32_1 = arith.constant 0 : i32
    return %c0_i32, %c0_i32_0 : i32, i32
  }
  func.func @transform_16(%arg0: i32, %arg1: i32) -> (i32, i32) {
    %c0_i32 = arith.constant 0 : i32
    %c0_i32_0 = arith.constant 0 : i32
    %c0_i32_1 = arith.constant 0 : i32
    return %c0_i32, %c0_i32_0 : i32, i32
  }
  func.func @transform_17(%arg0: i32, %arg1: i32) -> (i32, i32) {
    %c0_i32 = arith.constant 0 : i32
    %c0_i32_0 = arith.constant 0 : i32
    %c0_i32_1 = arith.constant 0 : i32
    return %c0_i32, %c0_i32_0 : i32, i32
  }
  func.func @transform_18(%arg0: i32, %arg1: i32) -> (i32, i32) {
    %c0_i32 = arith.constant 0 : i32
    %c0_i32_0 = arith.constant 0 : i32
    %c0_i32_1 = arith.constant 0 : i32
    return %c0_i32, %c0_i32_0 : i32, i32
  }
  func.func @transform_19(%arg0: i32, %arg1: i32) -> (i32, i32) {
    %c0_i32 = arith.constant 0 : i32
    %c0_i32_0 = arith.constant 0 : i32
    %c0_i32_1 = arith.constant 0 : i32
    return %c0_i32, %c0_i32_0 : i32, i32
  }
  func.func @transform_20(%arg0: i32, %arg1: i32) -> (i32, i32) {
    %c0_i32 = arith.constant 0 : i32
    %c0_i32_0 = arith.constant 0 : i32
    %c0_i32_1 = arith.constant 0 : i32
    return %c0_i32, %c0_i32_0 : i32, i32
  }
  func.func @transform_21(%arg0: i32, %arg1: i32) -> (i32, i32) {
    %c0_i32 = arith.constant 0 : i32
    %c0_i32_0 = arith.constant 0 : i32
    %c0_i32_1 = arith.constant 0 : i32
    return %c0_i32, %c0_i32_0 : i32, i32
  }
  func.func @transform_22(%arg0: i32, %arg1: i32) -> (i32, i32) {
    %c0_i32 = arith.constant 0 : i32
    %c0_i32_0 = arith.constant 0 : i32
    %c0_i32_1 = arith.constant 0 : i32
    return %c0_i32, %c0_i32_0 : i32, i32
  }
  func.func @transform_23(%arg0: i32, %arg1: i32) -> (i32, i32, i32) {
    %c0_i32 = arith.constant 0 : i32
    %c0_i32_0 = arith.constant 0 : i32
    return %arg1, %arg0, %c0_i32 : i32, i32, i32
  }
  func.func @transform_24(%arg0: i32, %arg1: i32) -> (i32, i32, i32) {
    %c0_i32 = arith.constant 0 : i32
    %c0_i32_0 = arith.constant 0 : i32
    return %arg1, %arg0, %c0_i32 : i32, i32, i32
  }
  func.func @transform_25(%arg0: i32, %arg1: i32) -> (i32, i32, i32) {
    %c0_i32 = arith.constant 0 : i32
    %c0_i32_0 = arith.constant 0 : i32
    return %arg1, %arg0, %c0_i32 : i32, i32, i32
  }
  func.func @transform_26(%arg0: i32, %arg1: i32) -> (i32, i32, i32) {
    %c0_i32 = arith.constant 0 : i32
    %c0_i32_0 = arith.constant 0 : i32
    return %arg1, %arg0, %c0_i32 : i32, i32, i32
  }
  func.func @transform_27(%arg0: i32, %arg1: i32) -> (i32, i32, i32) {
    %c0_i32 = arith.constant 0 : i32
    %c0_i32_0 = arith.constant 0 : i32
    return %arg1, %arg0, %c0_i32 : i32, i32, i32
  }
  func.func @transform_28(%arg0: i32, %arg1: i32) -> (i32, i32, i32) {
    %c0_i32 = arith.constant 0 : i32
    %c0_i32_0 = arith.constant 0 : i32
    return %arg1, %arg0, %c0_i32 : i32, i32, i32
  }
  func.func @transform_29(%arg0: i32, %arg1: i32) -> (i32, i32, i32) {
    %c0_i32 = arith.constant 0 : i32
    %c0_i32_0 = arith.constant 0 : i32
    return %arg1, %arg0, %c0_i32 : i32, i32, i32
  }
}

</mosaic_0001>

<bundles_post_ra>
// kernel: tpu_custom_call.1
= control target key start
LH: loop header
LB: loop body
LE: loop exit
PB: predicated region body
PF: predicated region fallthrough
CT: control target
= control target key end

     0   :  { %s3360_s6 = smov 1   ;;  %s3361_s10 = smov 2   ;;  %s4092_s0 = inlined_call_operand.smem [shape: u32[30], index: -1, kind: input, shape index: {}] }
   0x1   :  { %s3415_s5 = sld [smem:[%s4092_s0]]   ;;  %s3362_s14 = smov 3  }
   0x2   :  { %s3420_s9 = sld [smem:[%s4092_s0 + %s3360_s6]]   ;;  %s3363_s18 = smov 4  }
   0x3   :  { %s3425_s13 = sld [smem:[%s4092_s0 + %s3361_s10]]   ;;  %s3364_s22 = smov 5  }
   0x4   :  { %s3430_s17 = sld [smem:[%s4092_s0 + %s3362_s14]]   ;;  %s3365_s26 = smov 6  }
   0x5   :  { %s3435_s21 = sld [smem:[%s4092_s0 + %s3363_s18]]   ;;  %s3366_s30 = smov 7  }
   0x6   :  { %s3440_s25 = sld [smem:[%s4092_s0 + %s3364_s22]]   ;;  %s3367_s4 = smov 8  }
   0x7   :  { %4124 = sst [smem:[#allocation46_spill]] %s3415_s5  ;;  %s3368_s10 = smov 9  }
   0x8   :  { %s3445_s29 = sld [smem:[%s4092_s0 + %s3365_s26]]   ;;  %s3369_s15 = smov 10  }
   0x9   :  { %4125 = sst [smem:[#allocation47_spill]] %s3425_s13  ;;  %s3370_s20 = smov 11  }
   0xa   :  { %4126 = sst [smem:[#allocation48_spill]] %s3430_s17  ;;  %s3371_s26 = smov 12  }
   0xb   :  { %s3450_s3 = sld [smem:[%s4092_s0 + %s3366_s30]]   ;;  %s3372_s1 = smov 13  }
   0xc   :  { %4127 = sst [smem:[#allocation49_spill]] %s3440_s25  ;;  %s3373_s7 = smov 14  }
   0xd   :  { %s3455_s8 = sld [smem:[%s4092_s0 + %s3367_s4]]   ;;  %s3375_s22 = smov 16  }
   0xe   :  { %4128 = sst [smem:[#allocation50_spill]] %s3445_s29  ;;  %s3376_s28 = smov 17  }
   0xf   :  { %s3460_s14 = sld [smem:[%s4092_s0 + %s3368_s10]]  }
  0x10   :  { %s3465_s19 = sld [smem:[%s4092_s0 + %s3369_s15]]   ;;  %s3374_s15 = smov 15  }
  0x11   :  { %4129 = sst [smem:[#allocation51_spill]] %s3450_s3 }
  0x12   :  { %s3470_s24 = sld [smem:[%s4092_s0 + %s3370_s20]]  }
  0x13   :  { %4130 = sst [smem:[#allocation52_spill]] %s3455_s8 }
  0x14   :  { %s3475_s30 = sld [smem:[%s4092_s0 + %s3371_s26]]  }
  0x15   :  { %4131 = sst [smem:[#allocation53_spill]] %s3460_s14 }
  0x16   :  { %s3480_s6 = sld [smem:[%s4092_s0 + %s3372_s1]]  }
  0x17   :  { %s3485_s12 = sld [smem:[%s4092_s0 + %s3373_s7]]   ;;  %s3377_s7 = smov 18  }
  0x18   :  { %4132 = sst [smem:[#allocation54_spill]] %s3470_s24 }
  0x19   :  { %s3490_s20 = sld [smem:[%s4092_s0 + %s3374_s15]]   ;;  %s3378_s15 = smov 19  }
  0x1a   :  { %4133 = sst [smem:[#allocation55_spill]] %s3475_s30 }
  0x1b   :  { %s3495_s27 = sld [smem:[%s4092_s0 + %s3375_s22]]   ;;  %s3379_s22 = smov 20  }
  0x1c   :  { %4134 = sst [smem:[#allocation56_spill]] %s3480_s6 }
  0x1d   :  { %s3500_s4 = sld [smem:[%s4092_s0 + %s3376_s28]]   ;;  %s3380_s28 = smov 21  }
  0x1e   :  { %s3505_s30 = sld [smem:[%s4092_s0 + %s3377_s7]]   ;;  %s3381_s7 = smov 22  }
  0x1f   :  { %4135 = sst [smem:[#allocation57_spill]] %s3490_s20 }
  0x20   :  { %s3510_s20 = sld [smem:[%s4092_s0 + %s3378_s15]]   ;;  %s3382_s15 = smov 23  }
  0x21   :  { %4136 = sst [smem:[#allocation58_spill]] %s3495_s27 }
  0x22   :  { %s3515_s14 = sld [smem:[%s4092_s0 + %s3379_s22]]   ;;  %s3383_s22 = smov 24  }
  0x23   :  { %4137 = sst [smem:[#allocation59_spill]] %s3500_s4 }
  0x24   :  { %s3520_s4 = sld [smem:[%s4092_s0 + %s3380_s28]]   ;;  %s3384_s28 = smov 25  }
  0x25   :  { %s3525_s6 = sld [smem:[%s4092_s0 + %s3381_s7]]   ;;  %s3385_s7 = smov 26  }
  0x26   :  { %4138 = sst [smem:[#allocation60_spill]] %s3510_s20 }
  0x27   :  { %s3530_s25 = sld [smem:[%s4092_s0 + %s3382_s15]]   ;;  %s3386_s15 = smov 27  }
  0x28   :  { %4139 = sst [smem:[#allocation61_spill]] %s3515_s14 }
  0x29   :  { %s3535_s14 = sld [smem:[%s4092_s0 + %s3383_s22]]   ;;  %s3387_s22 = smov 28  }
  0x2a   :  { %4140 = sst [smem:[#allocation62_spill]] %s3520_s4 }
  0x2b   :  { %4141 = sst [smem:[#allocation63_spill]] %s3525_s6 }
  0x2c   :  { %s3540_s13 = sld [smem:[%s4092_s0 + %s3384_s28]]   ;;  %s3388_s28 = smov 29  }
  0x2d   :  { %4142 = sst [smem:[#allocation64_spill]] %s3530_s25 }
  0x2e   :  { %s3545_s6 = sld [smem:[%s4092_s0 + %s3385_s7]]  }
  0x2f   :  { %4143 = sst [smem:[#allocation65_spill]] %s3535_s14 }
  0x30   :  { %s3550_s25 = sld [smem:[%s4092_s0 + %s3386_s15]]  }
  0x31   :  { %s3555_s14 = sld [smem:[%s4092_s0 + %s3387_s22]]  }
  0x32   :  { %4144 = sst [smem:[#allocation66_spill]] %s3540_s13 }
  0x33   :  { %s3560_s13 = sld [smem:[%s4092_s0 + %s3388_s28]]  }
  0x34   :  { %4145 = sst [smem:[#allocation67_spill]] %s3545_s6 }
  0x36   :  { %4146 = sst [smem:[#allocation68_spill]] %s3550_s25 }
  0x37   :  { %4147 = sst [smem:[#allocation69_spill]] %s3555_s14 }
  0x39   :  { %4148 = sst [smem:[#allocation70_spill]] %s3560_s13 }
  0x3a   :  { %65 = vsyncpa [#allocation5], 0 }
  0x3b   :  { %67 = vsyncpa [#allocation5 + $0x1], 0 }
  0x3c   :  { %68 = vsyncpa [#allocation8], 0 }
  0x3d   :  { %70 = vsyncpa [#allocation8 + $0x1], 0 }
  0x3e   :  { %71 = vsyncpa [#allocation11], 0 }
  0x3f   :  { %72 = vsyncpa [#allocation14], 0 }
  0x40   :  { %73 = vsyncpa [#allocation17], 0 }
  0x41   :  { %74 = vsyncpa [#allocation20], 0 }
  0x42   :  { %75 = vsyncpa [#allocation23], 0 }
  0x43   :  { %76 = vsyncpa [#allocation6], 0 }
  0x44   :  { %78 = vsyncpa [#allocation6 + $0x1], 0 }
  0x45   :  { %79 = vsyncpa [#allocation27], 0 }
  0x46   :  { %81 = vsyncpa [#allocation27 + $0x1], 0 }
  0x47   :  { %82 = vsyncpa [#allocation30], 0 }
  0x48   :  { %84 = vsyncpa [#allocation30 + $0x1], 0 }
  0x49   :  { %85 = vsyncpa [#allocation33], 0 }
  0x4a   :  { %87 = vsyncpa [#allocation33 + $0x1], 0  ;;  %s3562_s7 = smov 0   ;;  %s3564_s0 = smov 0  }
  0x4b   :  { %s3566_s10 = smov 0   ;;  %s3568_s11 = smov 0  }
  0x4c   :  { %s3570_s15 = smov 0   ;;  %s3572_s16 = smov 0  }
  0x4d LB: > { %s4149_s4 = sld [smem:[#allocation62_spill]]  ;;  %s3593_s18 = sadd.s32 4294967295, %s3358_s16   ;;  %s3342_s0 = sphi %s3564_s0, %s4218_s0   ;;  %s3338_s7 = sphi %s3562_s7, %s4217_s7   ;;  %s3358_s16 = sphi %s3572_s16, %s93_s16   ;;  %s3354_s15 = sphi %s3570_s15, %s4216_s15   ;;  %s3350_s11 = sphi %s3568_s11, %s4215_s11   ;;  %s3346_s10 = sphi %s3566_s10, %s4219_s10  }
  0x4e   : > { %s4150_s3 = sld [smem:[#allocation51_spill]]  ;;  %p2352_p0 = scmp.ge.s32.totalorder %s3358_s16, 1 }
  0x4f   : > { %s4151_s17 = sld [smem:[#allocation48_spill]]  ;;  %p4114_p1 = scmp.eq.s32.totalorder %s3593_s18, 0 }
  0x50   : > { %s4152_s29 = sld [smem:[#allocation50_spill]]  ;;  %p834_p2 = scmp.lt.s32.totalorder %s3358_s16, 6 }
  0x51   : > { %s4153_s27 = sld [smem:[#allocation58_spill]]  ;;  %s3389_s26 = smov [#allocation10]  }
  0x52   : > { %s4154_s20 = sld [smem:[#allocation60_spill]]  ;;  %p3599_p3 = pnand %p2352_p0, %p834_p2 }
  0x53   : > { %s4155_s24 = sld [smem:[#allocation54_spill]]  ;;  %s857_s28 = sshll.u32 %s3389_s26, 4  ;;  %s858_s28 = int_to_ptr.vmem [resolvable:$true] %s857_s28 }
  0x54   : > { %s4156_s8 = sld [smem:[#allocation52_spill]]  ;;  %p2480_p4 = pneg %p3599_p3 }
  0x55   : > { %4157 = sst [smem:[#allocation71_spill]] %s3338_s7  ;;  %s3390_s25 = smov [#allocation13]  }
  0x56   : > { %4158 = sst [smem:[#allocation72_spill]] %s3350_s11  ;;  %s855_s22 = sshll.u32 %s4152_s29, 4  ;;  %s856_s22 = int_to_ptr.hbm [resolvable:$true] %s855_s22 }
  0x57   : > { %4159 = sst [smem:[#allocation73_spill]] %s3354_s15  ;;  %p3608_p5 = pnand %p2480_p4, %p4114_p1 }
  0x58   : > { %s3614_s13 = sshll.u32 %s3390_s25, 4  ;;  %s2682_s6 = sshra.s32 %s856_s22, 4  ;;  %s2683_s6 = int_to_ptr.hbm [resolvable:$true] %s2682_s6  ;;  %s884_s13 = int_to_ptr.vmem [resolvable:$true] %s3614_s13 }
  0x59   : > { %s2684_s14 = scalar_lea.hbm %s2683_s6, 8  ;;  %p3618_p7 = pneg %p3608_p5 }
  0x5a   : > { %s881_s1 = sshll.u32 %s4156_s8, 4  ;;  %p2685_p6 = scmp.ne.s32.totalorder %s2683_s6, %s2684_s14  ;;  %s3612_s1 = int_to_ptr.hbm [resolvable:$true] %s881_s1 }
  0x5b   : > { %s2689_s5 = scalar_lea.hbm %s4152_s29, 8  ;;  %p2690_p10 = scmp.lt.s32.totalorder %s2683_s6, %s4152_s29 }
  0x5c   : > { %p2687_p8 = pnand %p3618_p7, %p2685_p6  ;;  %p2691_p11 = scmp.lt.s32.totalorder %s2689_s5, %s2684_s14 }
  0x5e   : > { %p2688_p9 = pneg %p2687_p8  ;;  %p2692_p12 = por %p2691_p11, %p2690_p10 }
  0x60   : > { %p2693_p13 = pnand %p2692_p12, %p2688_p9 }
  0x62   : > { %2696 = shalt.err (!%p2693_p13)
}
  0x63   : > { %2483 = dma.hbm_to_vmem [thread:$0]  (!%p3608_p5), %s856_s22, 128, %s858_s28, [#allocation11]  }
  0x64   : > { %s2712_s25 = sshra.s32 %s3612_s1, 4  ;;  %s2719_s5 = scalar_lea.hbm %s4156_s8, 8  ;;  %s2713_s25 = int_to_ptr.hbm [resolvable:$true] %s2712_s25 }
  0x65   : > { %s2714_s11 = scalar_lea.hbm %s2713_s25, 8  ;;  %p2720_p6 = scmp.lt.s32.totalorder %s2713_s25, %s4156_s8 }
  0x66   : > { %p2715_p0 = scmp.ne.s32.totalorder %s2713_s25, %s2714_s11  ;;  %p2721_p8 = scmp.lt.s32.totalorder %s2719_s5, %s2714_s11 }
  0x68   : > { %p2717_p2 = pnand %p2715_p0, %p3618_p7  ;;  %p2722_p9 = por %p2721_p8, %p2720_p6 }
  0x6a   : > { %p2718_p4 = pneg %p2717_p2 }
  0x6c   : > { %p2723_p10 = pnand %p2722_p9, %p2718_p4 }
  0x6e   : > { %2726 = shalt.err (!%p2723_p10)
}
  0x6f   : > { %2489 = dma.hbm_to_vmem [thread:$0]  (!%p3608_p5), %s3612_s1, 128, %s884_s13, [#allocation14]  }
  0x70   : > { %s909_s14 = sshll.u32 %s4155_s24, 4  ;;  %s3391_s6 = smov [#allocation16]   ;;  %s910_s14 = int_to_ptr.hbm [resolvable:$true] %s909_s14 }
  0x71   : > { %s911_s22 = sshll.u32 %s3391_s6, 4  ;;  %s946_s28 = sshll.u32 %s4153_s27, 4  ;;  %s912_s22 = int_to_ptr.vmem [resolvable:$true] %s911_s22  ;;  %s947_s28 = int_to_ptr.hbm [resolvable:$true] %s946_s28 }
  0x72   : > { %s2742_s25 = sshra.s32 %s910_s14, 4  ;;  %s2749_s5 = scalar_lea.hbm %s4155_s24, 32  ;;  %s2743_s25 = int_to_ptr.hbm [resolvable:$true] %s2742_s25 }
  0x73   : > { %s2744_s11 = scalar_lea.hbm %s2743_s25, 32  ;;  %p2750_p0 = scmp.lt.s32.totalorder %s2743_s25, %s4155_s24 }
  0x74   : > { %p2745_p11 = scmp.ne.s32.totalorder %s2743_s25, %s2744_s11  ;;  %p2751_p2 = scmp.lt.s32.totalorder %s2749_s5, %s2744_s11 }
  0x76   : > { %p2747_p12 = pnand %p2745_p11, %p3618_p7  ;;  %p2752_p4 = por %p2751_p2, %p2750_p0 }
  0x78   : > { %p2748_p13 = pneg %p2747_p12 }
  0x7a   : > { %p2753_p6 = pnand %p2752_p4, %p2748_p13 }
  0x7c   : > { %2756 = shalt.err (!%p2753_p6)
}
  0x7d   : > { %s4103_s13 = smov 128   ;;  %s4105_s1 = smov 8  }
  0x7e   : > { %2495 = dma.hbm_to_vmem [thread:$0]  (!%p3608_p5), %s910_s14, 512, %s912_s22, [#allocation17], %s4103_s13, %s4103_s13, %s4105_s1  }
  0x7f   : > { %s3394_s6 = smov [#allocation19]   ;;  %s977_s25 = sshll.u32 %s4154_s20, 4  ;;  %s3649_s25 = int_to_ptr.hbm [resolvable:$true] %s977_s25 }
  0x80   : > { %s948_s8 = sshll.u32 %s3394_s6, 4  ;;  %s2772_s11 = sshra.s32 %s947_s28, 4  ;;  %s949_s8 = int_to_ptr.vmem [resolvable:$true] %s948_s8  ;;  %s2773_s11 = int_to_ptr.hbm [resolvable:$true] %s2772_s11 }
  0x81   : > { %s2774_s5 = scalar_lea.hbm %s2773_s11, 32  ;;  %s2779_s24 = scalar_lea.hbm %s4153_s27, 32 }
  0x82   : > { %p2775_p8 = scmp.ne.s32.totalorder %s2773_s11, %s2774_s5  ;;  %p2780_p11 = scmp.lt.s32.totalorder %s2773_s11, %s4153_s27 }
  0x83   : > { %p2781_p12 = scmp.lt.s32.totalorder %s2779_s24, %s2774_s5 }
  0x84   : > { %p2777_p9 = pnand %p2775_p8, %p3618_p7 }
  0x85   : > { %p2782_p13 = por %p2781_p12, %p2780_p11 }
  0x86   : > { %p2778_p10 = pneg %p2777_p9 }
  0x88   : > { %p2783_p0 = pnand %p2782_p13, %p2778_p10 }
  0x8a   : > { %2786 = shalt.err (!%p2783_p0)
}
  0x8b   : > { %2501 = dma.hbm_to_vmem [thread:$0]  (!%p3608_p5), %s947_s28, 512, %s949_s8, [#allocation20], %s4103_s13, %s4103_s13, %s4105_s1  }
  0x8c   : > { %s3395_s14 = smov [#allocation22]   ;;  %s2802_s6 = sshra.s32 %s3649_s25, 4  ;;  %s2803_s6 = int_to_ptr.hbm [resolvable:$true] %s2802_s6 }
  0x8d   : > { %s979_s22 = sshll.u32 %s3395_s14, 4  ;;  %s2804_s11 = scalar_lea.hbm %s2803_s6, 24  ;;  %s980_s22 = int_to_ptr.vmem [resolvable:$true] %s979_s22 }
  0x8e   : > { %p2805_p2 = scmp.ne.s32.totalorder %s2803_s6, %s2804_s11  ;;  %s2809_s24 = scalar_lea.hbm %s4154_s20, 24 }
  0x8f   : > { %p2810_p8 = scmp.lt.s32.totalorder %s2803_s6, %s4154_s20  ;;  %p2811_p9 = scmp.lt.s32.totalorder %s2809_s24, %s2804_s11 }
  0x90   : > { %p2807_p4 = pnand %p2805_p2, %p3618_p7 }
  0x91   : > { %p2812_p10 = por %p2811_p9, %p2810_p8 }
  0x92   : > { %p2808_p6 = pneg %p2807_p4 }
  0x94   : > { %p2813_p11 = pnand %p2812_p10, %p2808_p6 }
  0x96   : > { %2816 = shalt.err (!%p2813_p11)
}
  0x97   : > { %2507 = dma.hbm_to_vmem [thread:$0]  (!%p3608_p5), %s3649_s25, 384, %s980_s22, [#allocation23], %s4103_s13, %s4103_s13, %s4105_s1  }
  0x98   : > { %s4108_s8 = sadd.s32 4294967294, %s3358_s16   ;;  %s102_s28 = sadd.s32 1, %s3354_s15 }
  0x99   : > { %s142_s5 = sadd.s32 1, %s3346_s10  ;;  %p103_p12 = scmp.ge.s32.totalorder %s102_s28, 5 }
  0x9a   : > { %p149_p13 = scmp.ne.s32.totalorder %s3346_s10, %s3342_s0  ;;  %p150_p0 = scmp.eq.s32.totalorder %s3358_s16, 0 }
  0x9b   : > { %p155_p2 = scmp.ne.s32.totalorder %s3342_s0, %s3338_s7  ;;  %s4221_s28 = smov (%p103_p12, %s102_s28), 0 }
  0x9c   : > { %4163 = sst [smem:[#allocation74_spill]] %s4221_s28  ;;  %p3681_p4 = por %p150_p0, %p149_p13 }
  0x9d   : > { %p3687_p6 = por %p4114_p1, %p155_p2  ;;  %s137_s22 = ssub.s32 %s3354_s15, %s4221_s28 }
  0x9e   : > { %p653_p8 = scmp.eq.s32.totalorder %s3593_s18, 4  ;;  %p140_p9 = scmp.eq.s32.totalorder %s137_s22, 0 }
  0x9f   : > { %p659_p10 = scmp.eq.s32.totalorder %s4108_s8, 4  ;;  %p2553_p12 = scmp.lt.s32.totalorder %s3358_s16, 5 }
  0xa0   : > { %p3696_p11 = por %p653_p8, %p149_p13  ;;  %s4112_s13 = sand.u32 1, %s3346_s10  }
  0xa1   : > { %s3702_s11 = scalar_select %p140_p9, %s3346_s10, %s142_s5  }
  0xa2   : > { %p3704_p0 = por %p659_p10, %p155_p2  ;;  %s3711_s1 = sshll.u32 %s4112_s13, 3 }
  0xa3   : > { %4167 = sst [smem:[#allocation75_spill]] %s3702_s11  ;;  %s3714_s20 = sshll.u32 %s3354_s15, 3 }
  0xa4   : > { %s4168_s24 = scalar_select %p3704_p0, 1, 0 }
  0xa5   : > { %p3718_p13 = pnand %p2553_p12, %p3681_p4  ;;  %s1053_s5 = sand.u32 1, %s3358_s16  }
  0xa6   : > { %4169 = sst [smem:[#allocation76_spill]] %s4168_s24  ;;  %s1062_s8 = scalar_lea.hbm %s4151_s17, %s3714_s20 }
  0xa7   : > { %s1064_s27 = sshll.u32 %s1062_s8, 4  ;;  %s1057_s29 = scalar_lea.vmem [#allocation7], %s3711_s1  ;;  %s1065_s27 = int_to_ptr.hbm [resolvable:$true] %s1064_s27 }
  0xa8   : > { %s1066_s28 = sshll.u32 %s1057_s29, 4  ;;  %s3726_s13 = scalar_lea.sflag [#allocation8], %s1053_s5  ;;  %s1067_s28 = int_to_ptr.vmem [resolvable:$true] %s1066_s28 }
  0xa9   : > { %s2832_s15 = sshra.s32 %s1065_s27, 4  ;;  %p2836_p4 = pneg %p3718_p13  ;;  %s2833_s15 = int_to_ptr.hbm [resolvable:$true] %s2832_s15 }
  0xaa   : > { %s2834_s14 = scalar_lea.hbm %s2833_s15, 8  ;;  %s2839_s11 = scalar_lea.hbm %s4151_s17, 40 }
  0xab   : > { %p2835_p2 = scmp.ne.s32.totalorder %s2833_s15, %s2834_s14  ;;  %p2840_p10 = scmp.lt.s32.totalorder %s2833_s15, %s4151_s17 }
  0xac   : > { %p2841_p12 = scmp.lt.s32.totalorder %s2839_s11, %s2834_s14 }
  0xad   : > { %p2837_p8 = pnand %p2836_p4, %p2835_p2 }
  0xae   : > { %p2842_p1 = por %p2841_p12, %p2840_p10 }
  0xaf   : > { %p2838_p9 = pneg %p2837_p8 }
  0xb1   : > { %p2843_p0 = pnand %p2842_p1, %p2838_p9 }
  0xb3   : > { %2846 = shalt.err (!%p2843_p0)
}
  0xb4   : > { %2517 = dma.hbm_to_vmem [thread:$0]  (!%p3718_p13), %s1065_s27, 128, %s1067_s28, %s3726_s13  }
  0xb5   : > { %s866_s29 = sshll.u32 %s4150_s3, 4  ;;  %s3396_s8 = smov [#allocation12]   ;;  %s867_s29 = int_to_ptr.hbm [resolvable:$true] %s866_s29 }
  0xb6   : > { %s868_s5 = sshll.u32 %s3396_s8, 4  ;;  %s895_s24 = sshll.u32 %s3465_s19, 4  ;;  %s869_s5 = int_to_ptr.vmem [resolvable:$true] %s868_s5  ;;  %s896_s24 = int_to_ptr.hbm [resolvable:$true] %s895_s24 }
  0xb7   : > { %s2862_s15 = sshra.s32 %s867_s29, 4  ;;  %s2869_s14 = scalar_lea.hbm %s4150_s3, 16  ;;  %s2863_s15 = int_to_ptr.hbm [resolvable:$true] %s2862_s15 }
  0xb8   : > { %s2864_s11 = scalar_lea.hbm %s2863_s15, 16  ;;  %p2870_p8 = scmp.lt.s32.totalorder %s2863_s15, %s4150_s3 }
  0xb9   : > { %p2865_p1 = scmp.ne.s32.totalorder %s2863_s15, %s2864_s11  ;;  %p2871_p9 = scmp.lt.s32.totalorder %s2869_s14, %s2864_s11 }
  0xbb   : > { %p2867_p0 = pnand %p2865_p1, %p3618_p7  ;;  %p2872_p10 = por %p2871_p9, %p2870_p8 }
  0xbd   : > { %p2868_p2 = pneg %p2867_p0 }
  0xbf   : > { %p2873_p12 = pnand %p2872_p10, %p2868_p2 }
  0xc1   : > { %2876 = shalt.err (!%p2873_p12)
}
  0xc2   : > { %s4171_s27 = smov 8   ;;  %s4172_s28 = smov 128  }
  0xc3   : > { %2486 = dma.hbm_to_vmem [thread:$0]  (!%p3608_p5), %s867_s29, 256, %s869_s5, [#allocation11], %s4172_s28, %s4172_s28, %s4171_s27  }
  0xc4   : > { %s3397_s8 = smov [#allocation15]   ;;  %s929_s7 = sshll.u32 %s3485_s12, 4  ;;  %s3750_s7 = int_to_ptr.hbm [resolvable:$true] %s929_s7 }
  0xc5   : > { %s897_s17 = sshll.u32 %s3397_s8, 4  ;;  %s2892_s15 = sshra.s32 %s896_s24, 4  ;;  %s898_s17 = int_to_ptr.vmem [resolvable:$true] %s897_s17  ;;  %s2893_s15 = int_to_ptr.hbm [resolvable:$true] %s2892_s15 }
  0xc6   : > { %s2894_s11 = scalar_lea.hbm %s2893_s15, 32  ;;  %s2899_s14 = scalar_lea.hbm %s3465_s19, 32 }
  0xc7   : > { %p2895_p1 = scmp.ne.s32.totalorder %s2893_s15, %s2894_s11  ;;  %p2900_p8 = scmp.lt.s32.totalorder %s2893_s15, %s3465_s19 }
  0xc8   : > { %p2901_p9 = scmp.lt.s32.totalorder %s2899_s14, %s2894_s11 }
  0xc9   : > { %p2897_p0 = pnand %p2895_p1, %p3618_p7 }
  0xca   : > { %p2902_p10 = por %p2901_p9, %p2900_p8 }
  0xcb   : > { %p2898_p2 = pneg %p2897_p0 }
  0xcd   : > { %p2903_p12 = pnand %p2902_p10, %p2898_p2 }
  0xcf   : > { %2906 = shalt.err (!%p2903_p12)
}
  0xd0   : > { %2492 = dma.hbm_to_vmem [thread:$0]  (!%p3608_p5), %s896_s24, 512, %s898_s17, [#allocation14], %s4172_s28, %s4172_s28, %s4171_s27  }
  0xd1   : > { %s963_s29 = sshll.u32 %s3505_s30, 4  ;;  %s3398_s5 = smov [#allocation18]   ;;  %s3762_s29 = int_to_ptr.hbm [resolvable:$true] %s963_s29 }
  0xd2   : > { %s931_s8 = sshll.u32 %s3398_s5, 4  ;;  %s2922_s15 = sshra.s32 %s3750_s7, 4  ;;  %s932_s8 = int_to_ptr.vmem [resolvable:$true] %s931_s8  ;;  %s2923_s15 = int_to_ptr.hbm [resolvable:$true] %s2922_s15 }
  0xd3   : > { %s2924_s11 = scalar_lea.hbm %s2923_s15, 32  ;;  %s2929_s14 = scalar_lea.hbm %s3485_s12, 32 }
  0xd4   : > { %p2925_p1 = scmp.ne.s32.totalorder %s2923_s15, %s2924_s11  ;;  %p2930_p8 = scmp.lt.s32.totalorder %s2923_s15, %s3485_s12 }
  0xd5   : > { %p2931_p9 = scmp.lt.s32.totalorder %s2929_s14, %s2924_s11 }
  0xd6   : > { %p2927_p0 = pnand %p2925_p1, %p3618_p7 }
  0xd7   : > { %p2932_p10 = por %p2931_p9, %p2930_p8 }
  0xd8   : > { %p2928_p2 = pneg %p2927_p0 }
  0xda   : > { %p2933_p12 = pnand %p2932_p10, %p2928_p2 }
  0xdc   : > { %2936 = shalt.err (!%p2933_p12)
}
  0xdd   : > { %2498 = dma.hbm_to_vmem [thread:$0]  (!%p3608_p5), %s3750_s7, 512, %s932_s8, [#allocation17], %s4172_s28, %s4172_s28, %s4171_s27  }
  0xde   : > { %s3399_s17 = smov [#allocation21]   ;;  %s994_s5 = sshll.u32 %s4149_s4, 4  ;;  %s3776_s5 = int_to_ptr.hbm [resolvable:$true] %s994_s5 }
  0xdf   : > { %s965_s24 = sshll.u32 %s3399_s17, 4  ;;  %s2952_s15 = sshra.s32 %s3762_s29, 4  ;;  %s966_s24 = int_to_ptr.vmem [resolvable:$true] %s965_s24  ;;  %s2953_s15 = int_to_ptr.hbm [resolvable:$true] %s2952_s15 }
  0xe0   : > { %s2954_s11 = scalar_lea.hbm %s2953_s15, 32  ;;  %s2959_s14 = scalar_lea.hbm %s3505_s30, 32 }
  0xe1   : > { %p2955_p1 = scmp.ne.s32.totalorder %s2953_s15, %s2954_s11  ;;  %p2960_p8 = scmp.lt.s32.totalorder %s2953_s15, %s3505_s30 }
  0xe2   : > { %p2961_p9 = scmp.lt.s32.totalorder %s2959_s14, %s2954_s11 }
  0xe3   : > { %p2957_p0 = pnand %p2955_p1, %p3618_p7 }
  0xe4   : > { %p2962_p10 = por %p2961_p9, %p2960_p8 }
  0xe5   : > { %p2958_p2 = pneg %p2957_p0 }
  0xe7   : > { %p2963_p12 = pnand %p2962_p10, %p2958_p2 }
  0xe9   : > { %2966 = shalt.err (!%p2963_p12)
}
  0xea   : > { %2504 = dma.hbm_to_vmem [thread:$0]  (!%p3608_p5), %s3762_s29, 512, %s966_s24, [#allocation20], %s4172_s28, %s4172_s28, %s4171_s27  }
  0xeb   : > { %s3400_s7 = smov [#allocation24]   ;;  %s1032_s17 = scalar_lea.hbm %s3420_s9, %s3714_s20 }
  0xec   : > { %s996_s8 = sshll.u32 %s3400_s7, 4  ;;  %s2982_s15 = sshra.s32 %s3776_s5, 4  ;;  %s997_s8 = int_to_ptr.vmem [resolvable:$true] %s996_s8  ;;  %s2983_s15 = int_to_ptr.hbm [resolvable:$true] %s2982_s15 }
  0xed   : > { %s2984_s11 = scalar_lea.hbm %s2983_s15, 32  ;;  %s2989_s14 = scalar_lea.hbm %s4149_s4, 32 }
  0xee   : > { %p2985_p1 = scmp.ne.s32.totalorder %s2983_s15, %s2984_s11  ;;  %p2990_p8 = scmp.lt.s32.totalorder %s2983_s15, %s4149_s4 }
  0xef   : > { %p2991_p9 = scmp.lt.s32.totalorder %s2989_s14, %s2984_s11 }
  0xf0   : > { %p2987_p0 = pnand %p2985_p1, %p3618_p7 }
  0xf1   : > { %p2992_p10 = por %p2991_p9, %p2990_p8 }
  0xf2   : > { %p2988_p2 = pneg %p2987_p0 }
  0xf4   : > { %p2993_p12 = pnand %p2992_p10, %p2988_p2 }
  0xf6   : > { %2996 = shalt.err (!%p2993_p12)
}
  0xf7   : > { %2510 = dma.hbm_to_vmem [thread:$0]  (!%p3608_p5), %s3776_s5, 512, %s997_s8, [#allocation23], %s4172_s28, %s4172_s28, %s4171_s27  }
  0xf8   : > { %s1034_s26 = sshll.u32 %s1032_s17, 4  ;;  %s1027_s29 = scalar_lea.vmem [#allocation4], %s3711_s1  ;;  %s1035_s26 = int_to_ptr.hbm [resolvable:$true] %s1034_s26 }
  0xf9   : > { %s1036_s24 = sshll.u32 %s1027_s29, 4  ;;  %s4173_s7 = sand.u32 1, %s3346_s10   ;;  %s1037_s24 = int_to_ptr.vmem [resolvable:$true] %s1036_s24 }
  0xfa   : > { %s1024_s15 = scalar_lea.sflag [#allocation5], %s4173_s7  ;;  %s3012_s11 = sshra.s32 %s1035_s26, 4  ;;  %s3013_s11 = int_to_ptr.hbm [resolvable:$true] %s3012_s11 }
  0xfb   : > { %s3014_s2 = scalar_lea.hbm %s3013_s11, 8  ;;  %s3019_s14 = scalar_lea.hbm %s3420_s9, 40 }
  0xfc   : > { %p3015_p7 = scmp.ne.s32.totalorder %s3013_s11, %s3014_s2  ;;  %p3020_p2 = scmp.lt.s32.totalorder %s3013_s11, %s3420_s9 }
  0xfd   : > { %p3021_p8 = scmp.lt.s32.totalorder %s3019_s14, %s3014_s2 }
  0xfe   : > { %p3017_p1 = pnand %p3015_p7, %p2836_p4 }
  0xff   : > { %p3022_p9 = por %p3021_p8, %p3020_p2 }
 0x100   : > { %p3018_p0 = pneg %p3017_p1 }
 0x102   : > { %p3023_p5 = pnand %p3022_p9, %p3018_p0 }
 0x104   : > { %3026 = shalt.err (!%p3023_p5)
}
 0x105   : > { %2514 = dma.hbm_to_vmem [thread:$0]  (!%p3718_p13), %s1035_s26, 128, %s1037_s24, %s1024_s15  }
 0x106   : > { %s1082_s27 = scalar_lea.hbm %s3435_s21, %s3714_s20  ;;  %s1077_s5 = scalar_lea.vmem [#allocation9], %s3711_s1 }
 0x107   : > { %s1084_s28 = sshll.u32 %s1082_s27, 4  ;;  %s1086_s8 = sshll.u32 %s1077_s5, 4  ;;  %s1085_s28 = int_to_ptr.hbm [resolvable:$true] %s1084_s28  ;;  %s1087_s8 = int_to_ptr.vmem [resolvable:$true] %s1086_s8 }
 0x108   : > { %s3042_s17 = sshra.s32 %s1085_s28, 4  ;;  %s3049_s7 = scalar_lea.hbm %s3435_s21, 40  ;;  %s3043_s17 = int_to_ptr.hbm [resolvable:$true] %s3042_s17 }
 0x109   : > { %s3044_s29 = scalar_lea.hbm %s3043_s17, 8  ;;  %p3050_p1 = scmp.lt.s32.totalorder %s3043_s17, %s3435_s21 }
 0x10a   : > { %p3045_p10 = scmp.ne.s32.totalorder %s3043_s17, %s3044_s29  ;;  %p3051_p0 = scmp.lt.s32.totalorder %s3049_s7, %s3044_s29 }
 0x10c   : > { %p3047_p12 = pnand %p3045_p10, %p2836_p4  ;;  %p3052_p2 = por %p3051_p0, %p3050_p1 }
 0x10e   : > { %p3048_p7 = pneg %p3047_p12 }
 0x110   : > { %p3053_p8 = pnand %p3052_p2, %p3048_p7 }
 0x112   : > { %3056 = shalt.err (!%p3053_p8)
}
 0x113   : > { %2520 = dma.hbm_to_vmem [thread:$0]  (!%p3718_p13), %s1085_s28, 128, %s1087_s8, %s3726_s13  }
 0x114   : > { %1095 = sbr.rel (%p3599_p3) target bundleno = 1526 (0x5f6), region = 112  ;;  %s3826_s20 = sand.u32 (!%p3599_p3), 1, %s3342_s0  }
 0x115   : > { %s3829_s1 = sshll.u32 (!%p3599_p3), %s3826_s20, 3  ;;  %s1098_s26 = scalar_lea.sflag (!%p3599_p3), [#allocation5], %s3826_s20 }
 0x116   : > { %s1101_s24 = scalar_lea.vmem (!%p3599_p3), [#allocation4], %s3829_s1 }
 0x119   : > { %3293 = dma.done.wait (%p3687_p6), %s1098_s26, 128  }
 0x11a   : > { %3295 = vsyncadd (%p3687_p6), %s1098_s26, 4294967168  ;;  %s3838_s23 = sand.u32 1, %s3593_s18   ;;  %s1111_s22 = scalar_lea.vmem [#allocation7], %s3829_s1 }
 0x11b   : > { %s1108_s13 = scalar_lea.sflag [#allocation8], %s3838_s23 }
 0x11c   : > { %3297 = dma.done.wait (%p3687_p6), %s1108_s13, 256  }
 0x11d   : > { %3299 = vsyncadd (%p3687_p6), %s1108_s13, 4294967040  ;;  %p4174_p3 = scmp.eq.s32.totalorder %s3593_s18, 0 }
 0x11f   : > { %3301 = dma.done.wait (%p4174_p3), [#allocation11], 384   ;;  %p4175_p13 = pmov %p4174_p3 }
 0x120   : > { %p4176_p4 = pmov %p4174_p3 }
 0x121   : > { %3303 = vsyncadd (%p4175_p13), [#allocation11], 4294966912 }
 0x122   : > { %3305 = dma.done.wait (%p4176_p4), [#allocation14], 640   ;;  %p4177_p9 = pmov %p4174_p3 }
 0x123   : > { %p4178_p5 = pmov %p4174_p3 }
 0x124   : > { %3307 = vsyncadd (%p4177_p9), [#allocation14], 4294966656 }
 0x125   : > { %3309 = dma.done.wait (%p4178_p5), [#allocation17], 1024   ;;  %p4179_p10 = pmov %p4174_p3 }
 0x126   : > { %p4180_p6 = pmov %p4174_p3 }
 0x127   : > { %3311 = vsyncadd (%p4179_p10), [#allocation17], 4294966272 }
 0x128   : > { %3313 = dma.done.wait (%p4180_p6), [#allocation20], 1024   ;;  %p4181_p12 = pmov %p4174_p3 }
 0x129   : > { %p4182_p7 = pmov %p4174_p3 }
 0x12a   : > { %3315 = vsyncadd (%p4181_p12), [#allocation20], 4294966272 }
 0x12b   : > { %3317 = dma.done.wait (%p4182_p7), [#allocation23], 896   ;;  %p4183_p1 = pmov %p4174_p3 }
 0x12c   : > { %s4184_s25 = sld [smem:[#allocation72_spill]]  ;;  %s1262_s8 = scalar_lea.vmem [#allocation25], %s3829_s1 }
 0x12d   : > { %3319 = vsyncadd (%p4183_p1), [#allocation23], 4294966400  ;;  %s4185_s11 = sld [smem:[#allocation46_spill]]  ;;  %s1269_s17 = scalar_lea.vmem [#allocation26], %s3829_s1 }
 0x12e   : > { %s4186_s2 = sld [smem:[#allocation47_spill]]  ;;  %s1276_s18 = scalar_lea.vmem [#allocation28], %s3829_s1 }
 0x12f   : > { %s1283_s29 = scalar_lea.vmem [#allocation29], %s3829_s1  ;;  %s1297_s26 = scalar_lea.vmem [#allocation32], %s3829_s1 }
 0x132   : > { %p1305_p0 = scmp.lt.s32.totalorder %s4184_s25, 4  ;;  %p2394_p2 = scmp.ne.s32.totalorder %s4184_s25, 0 }
 0x133   : > { %s4187_s15 = sld [smem:[#allocation49_spill]] (!%p2394_p2) }
 0x134   : > { %s1306_s14 = scalar_select %p1305_p0, %s4184_s25, 4 }
 0x135   : > { %1326 = sbr.rel (%p2394_p2) target bundleno = 317 (0x13d), region = 168 }
 0x136   : > { %s2392_s27 = sshll.u32 %s1306_s14, 3 }
 0x137   : > { %s1311_s28 = scalar_lea.vmem %s4185_s11, %s2392_s27  ;;  %s1318_s5 = scalar_lea.vmem %s4186_s2, %s2392_s27 }
 0x13a   : > { %v1327_v0 = vld [vmem:[#allocation10] sm:$0xff]  ;;  %vm1328_vm0 = vcmask 261120   ;;  %vm1331_vm1 = vcmask 130048  }
 0x13b   : > { %v1330_v1 = vld [vmem:[%s4187_s15] sm:$0xff]  ;;  %1329 = vst.msk [vmem:[#allocation2] sm:$0xff] %vm1328_vm0, %v1327_v0 }
 0x13c   : > { %1332 = vst.msk [vmem:[#allocation3] sm:$0xff] %vm1331_vm1, %v1330_v1 }
 0x13d PF: > { %v1335_v2 = vld [vmem:[%s1318_s5] sm:$0xff]  ;;  %s4188_s11 = sld [smem:[#allocation56_spill]]  ;;  %v1347_v3 = vld [vmem:[#allocation12 + $0x8] sm:$0xff]  ;;  %v3401_v4 = vmov 0   ;;  %v1348_v5 = vld [vmem:[#allocation13] sm:$0xff]  ;;  %vm1349_vm2 = vcmask 64512  }
 0x13e   : > { %2660 = vset.pattern.permute.xlu0 %v3401_v4  ;;  %1391 = vmatpush.msra.mxu1 %v1347_v3  ;;  %v1346_v6 = vld [vmem:[#allocation12] sm:$0xff]  ;;  %v1333_v7 = vld [vmem:[%s1311_s28] sm:$0xff]  ;;  %v1438_v8 = vld [vmem:[#allocation16 + $0x18] sm:$0xff]  ;;  %s3402_s15 = smov 64   ;;  %vm1411_vm3 = vcmask 261120   ;;  %vm1373_vm4 = vcmask 130048  }
 0x13f   : > { %1341 = vperm.xlu0 %2660, %v1335_v2   ;;  %1368 = vmatpush.msra.mxu0 %v1348_v5  ;;  %v1437_v9 = vld [vmem:[#allocation16 + $0x10] sm:$0xff]  ;;  %v1436_v11 = vld [vmem:[#allocation16 + $0x8] sm:$0xff]  ;;  %v1435_v12 = vld [vmem:[#allocation16] sm:$0xff]  ;;  %s4189_s25 = sld [smem:[#allocation53_spill]]  ;;  %s3403_s14 = smov 96   ;;  %vm1613_vm9 = vcmask 195584  }
 0x140   : > { %1392 = vmatpush.msra.mxu1 %v1346_v6  ;;  %2395 = vmatmul.msk.f32.vlgmr.msra.gmra.mxu0 %vm1349_vm2, %v1333_v7  ;;  %v1406_v17 = vld [vmem:[#allocation15 + $0x18] sm:$0xff]  ;;  %v1405_v18 = vld [vmem:[#allocation15 + $0x10] sm:$0xff]  ;;  %s4190_s2 = sld [smem:[#allocation55_spill]]  ;;  %v1404_v19 = vld [vmem:[#allocation15 + $0x8] sm:$0xff]  ;;  %s3404_s27 = smov 32  }
 0x141   : > { %1454 = vmatpush.msra.mxu3 %v1438_v8  ;;  %1427 = vmatpush.msra.mxu2 %v1406_v17  ;;  %v1403_v20 = vld [vmem:[#allocation15] sm:$0xff]  ;;  %v1612_v53 = vld [vmem:[#allocation22 + $0x10] sm:$0xff]  ;;  %v1609_v54 = vld [vmem:[#allocation21 + $0x18] sm:$0xff]  ;;  %s4192_s28 = sld [smem:[#allocation61_spill]]  ;;  %s4193_s5 = scalar_lea.vmem [#allocation9], %s3829_s1 }
 0x142   : > { %v1345_v13 = vld [vmem:[#allocation2] sm:$0xff]  ;;  %v1520_v55 = vld [vmem:[#allocation18 + $0x18] sm:$0xff]  ;;  %v1608_v56 = vld [vmem:[#allocation21 + $0x10] sm:$0xff] }
 0x143   : > { %v2661_v10 = vld [vmem:[%s4188_s11] ss:$0 sm:$0xff]  ;;  %1455 = vmatpush.msra.mxu3 %v1437_v9  ;;  %v1338_v14 = vld [vmem:[#allocation3] sm:$0xff]  ;;  %1428 = vmatpush.msra.mxu2 %v1405_v18  ;;  %v1519_v57 = vld [vmem:[#allocation18 + $0x10] sm:$0xff]  ;;  %s4194_s11 = sld [smem:[#allocation59_spill]] }
 0x144   : > { %v1611_v58 = vld [vmem:[#allocation22 + $0x8] sm:$0xff]  ;;  %1539 = vmatpush.msrb.mxu0 %v1520_v55  ;;  %v1610_v60 = vld [vmem:[#allocation22] sm:$0xff]  ;;  %v1334_v6 = vld [vmem:[%s1101_s24] sm:$0xff]  ;;  %s4191_s24 = sld [smem:[#allocation57_spill]] }
 0x145   : > { %1456 = vmatpush.msra.mxu3 %v1436_v11  ;;  %1429 = vmatpush.msra.mxu2 %v1404_v19  ;;  %v2662_v25 = vld [vmem:[%s4189_s25] ss:$0 sm:$0xff]  ;;  %v1607_v59 = vld [vmem:[#allocation21 + $0x8] sm:$0xff]  ;;  %v1551_v7 = vld [vmem:[#allocation19 + $0x18] sm:$0xff]  ;;  %s4195_s25 = sld [smem:[#allocation63_spill]] }
 0x146   : > { %v2663_v30 = vld [vmem:[%s4190_s2] ss:$0 sm:$0xff]  ;;  %v1518_v61 = vld [vmem:[#allocation18 + $0x8] sm:$0xff]  ;;  %1540 = vmatpush.msrb.mxu0 %v1519_v57  ;;  %1571 = vmatpush.msrb.mxu1 %v1551_v7  ;;  %v1550_v9 = vld [vmem:[#allocation19 + $0x10] sm:$0xff]  ;;  %s4197_s2 = sld [smem:[#allocation69_spill]] }
 0x147   : > { %1485 = vrot.lane.b32.xlu0 %v2661_v10, %s3402_s15  ;;  %1457 = vmatpush.msra.mxu3 %v1435_v12  ;;  %v1606_v62 = vld [vmem:[#allocation21] sm:$0xff]  ;;  %v1549_v10 = vld [vmem:[#allocation19 + $0x8] sm:$0xff]  ;;  %v1666_v12 = vld [vmem:[#allocation24 + $0x18] sm:$0xff] }
 0x148   : > { %2398 = vmatmul.msk.f32.vlgmr.msra.gmra.mxu3 %vm1411_vm3, %v1345_v13  ;;  %1430 = vmatpush.msra.mxu2 %v1403_v20  ;;  %v1517_v63 = vld [vmem:[#allocation18] sm:$0xff]  ;;  %v1337_v17 = vld [vmem:[%s4193_s5] sm:$0xff] }
 0x149   : > { %1649 = vmatpush.msrb.mxu3 %v1609_v54  ;;  %1541 = vmatpush.msrb.mxu0 %v1518_v61  ;;  %v1548_v11 = vld [vmem:[#allocation19] sm:$0xff] }
 0x14a   : > { %1630 = vmatpush.msrb.mxu2 %v1612_v53  ;;  %1572 = vmatpush.msrb.mxu1 %v1550_v9  ;;  %v2664_v18 = vld [vmem:[%s4191_s24] ss:$0 sm:$0xff] }
 0x14b   : > { %1650 = vmatpush.msrb.mxu3 %v1608_v56  ;;  %1542 = vmatpush.msrb.mxu0 %v1517_v63 }
 0x14c   : > { %1631 = vmatpush.msrb.mxu2 %v1611_v58  ;;  %1573 = vmatpush.msrb.mxu1 %v1549_v10 }
 0x14d   : > { %1651 = vmatpush.msrb.mxu3 %v1607_v59  ;;  %1686 = vmatpush.msra.mxu0 %v1666_v12 }
 0x14e   : > { %1632 = vmatpush.msrb.mxu2 %v1610_v60  ;;  %1574 = vmatpush.msrb.mxu1 %v1548_v11 }
 0x14f   : > { %1652 = vmatpush.msrb.mxu3 %v1606_v62 }
 0x1b1   : > { %v1342_v15 = vpop.permute.xlu0 %1341 }
 0x1b2   : > { %v1344_v16 = vmul.f32 %v1342_v15, %v1338_v14  ;;  %v1664_v14 = vld [vmem:[#allocation24 + $0x8] sm:$0xff]  ;;  %v1663_v15 = vld [vmem:[#allocation24] sm:$0xff] }
 0x1b4   : > { %2396 = vmatmul.msk.f32.vlgmr.msra.gmra.mxu1 %vm1373_vm4, %v1344_v16  ;;  %v1336_v16 = vld [vmem:[%s1111_s22] sm:$0xff]  ;;  %s4196_s22 = sld [smem:[#allocation72_spill]] }
 0x1b9   : > { %v1486_v21 = vpop.permute.xlu0 %1485 }
 0x1bd   : > { %v1370_v24 = vpop.f32.mrf.mxu0 }
 0x1cb   : > { %v1459_v22 = vpop.f32.mrf.mxu3 }
 0x1cc   : > { %v1488_v23 = vadd.f32 %v1486_v21, %v1459_v22 }
 0x1ce   : > { %1490 = vrot.lane.b32.xlu1 %v1488_v23, %s3402_s15  ;;  %v2665_v23 = vld [vmem:[%s4192_s28] ss:$0 sm:$0xff]  ;;  %s1841_s28 = sshll.u32 %s1297_s26, 4  ;;  %s1842_s28 = int_to_ptr.vmem [resolvable:$true] %s1841_s28 }
 0x231   : > { %v1394_v26 = vpop.f32.mrf.mxu1 }
 0x232   : > { %v1395_v27 = vadd.f32 %v1394_v26, %v1370_v24 }
 0x234   : > { %v1401_v28 = vadd.f32 %v2662_v25, %v1395_v27 }
 0x236   : > { %v1402_v29 = vmax.f32 %v1401_v28, 0.0  ;;  %v2666_v28 = vld [vmem:[%s4194_s11] ss:$0 sm:$0xff]  ;;  %s4118_s11 = scalar_lea.sflag [#allocation33], %s3838_s23 }
 0x238   : > { %2397 = vmatmul.msk.f32.vlgmr.msra.gmra.mxu2 %vm1411_vm3, %v1402_v29 }
 0x240   : > { %v1491_v45 = vpop.permute.xlu1 %1490  ;;  %2401 = vmatmul.msk.f32.vlgmr.msrb.gmra.mxu2 %vm1613_vm9, %v1334_v6 }
 0x2bb   : > { %v1432_v31 = vpop.f32.mrf.mxu2 }
 0x2bc   : > { %v1433_v32 = vadd.f32 %v2663_v30, %v1432_v31 }
 0x2be   : > { %v1462_v33 = vadd.f32 %v1459_v22, %v1433_v32 }
 0x2c0   : > { %v1463_v34 = vsub.f32 0.0, %v1462_v33  ;;  %v2667_v33 = vld [vmem:[%s4195_s25] ss:$0 sm:$0xff] }
 0x2c2   : > { %v1464_v35 = vmul.f32 1.442695, %v1463_v34 }
 0x2c3   : > { %v1634_v22 = vpop.f32.mrf.mxu2 }
 0x2c4   : > { %2668 = vpow2.f32 %v1464_v35 }
 0x2ca   : > { %v2669_v36 = vpop.eup %2668 }
 0x2cb   : > { %v1466_v37 = vadd.f32 1.0, %v2669_v36 }
 0x2cd   : > { %2670 = vrcp.f32 %v1466_v37  ;;  %v1478_v41 = vand.u32 2147483648, %v1466_v37  ;;  %v1476_v43 = vand.u32 2147483647, %v1466_v37  ;;  %vm1472_vm6 = vweird.f32 %v1466_v37 }
 0x2cf   : > { %v1479_v46 = vor.u32 1.1754944e-38, %v1478_v41  ;;  %vm1477_vm8 = vcmp.eq.f32.partialorder %v1476_v43, 8.507059e+37 }
 0x2d3   : > { %v2671_v38 = vpop.eup %2670 }
 0x2d4   : > { %v1468_v39 = vmul.f32 %v2671_v38, %v1466_v37  ;;  %vm1473_vm5 = vweird.f32 %v2671_v38 }
 0x2d5   : > { %vm1474_vm7 = vmor %vm1472_vm6, %vm1473_vm5 }
 0x2d6   : > { %v1469_v40 = vsub.f32 1.0, %v1468_v39 }
 0x2d8   : > { %v1470_v42 = vmul.f32 %v2671_v38, %v1469_v40 }
 0x2da   : > { %v1471_v44 = vadd.f32 %v2671_v38, %v1470_v42 }
 0x2dc   : > { %v1475_v47 = vsel %vm1474_vm7, %v2671_v38, %v1471_v44 }
 0x2dd   : > { %v1480_v48 = vsel %vm1477_vm8, %v1479_v46, %v1475_v47 }
 0x2de   : > { %v1493_v49 = vmul.f32 %v1491_v45, %v1480_v48  ;;  %v1500_v1 = vsub.f32 1.0, %v1480_v48 }
 0x2e0   : > { %1495 = vrot.lane.b32.xlu1 %v1493_v49, %s3402_s15  ;;  %s3405_s15 = smov 16  }
 0x2e8   : > { %1590 = vrot.lane.b32.xlu1 %v1336_v16, %s3405_s15 }
 0x352   : > { %v1496_v50 = vpop.permute.xlu1 %1495 }
 0x353   : > { %v1498_v51 = vadd.f32 %v1496_v50, %v1433_v32 }
 0x355   : > { %2672 = vtanh.f32 %v1498_v51 }
 0x35b   : > { %v2673_v52 = vpop.eup %2672 }
 0x35c   : > { %1502 = vrot.lane.b32.xlu2 %v2673_v52, %s3403_s14 }
 0x364   : > { %1506 = vrot.lane.b32.xlu2 %v1345_v13, %s3404_s27  ;;  %v1665_v13 = vld [vmem:[#allocation24 + $0x10] sm:$0xff]  ;;  %s3926_s27 = sshll.u32 %s4196_s22, 3  ;;  %s3092_s22 = scalar_lea.hbm %s4197_s2, 40 }
 0x365   : > { %1687 = vmatpush.msra.mxu0 %v1665_v13  ;;  %s1839_s24 = scalar_lea.hbm %s4197_s2, %s3926_s27 }
 0x366   : > { %s1843_s5 = sshll.u32 %s1839_s24, 4  ;;  %s1844_s5 = int_to_ptr.hbm [resolvable:$true] %s1843_s5 }
 0x367   : > { %1688 = vmatpush.msra.mxu0 %v1664_v14 }
 0x369   : > { %1689 = vmatpush.msra.mxu0 %v1663_v15 }
 0x36c   : > { %1705 = vrot.lane.b32.xlu2 %v1337_v17, %s3405_s15  ;;  %s3086_s15 = sshra.s32 %s1844_s5, 4  ;;  %s3087_s15 = int_to_ptr.hbm [resolvable:$true] %s3086_s15 }
 0x36d   : > { %s3088_s25 = scalar_lea.hbm %s3087_s15, 8  ;;  %p3093_p4 = scmp.lt.s32.totalorder %s3087_s15, %s4197_s2 }
 0x36e   : > { %p3089_p8 = scmp.ne.s32.totalorder %s3087_s15, %s3088_s25  ;;  %p3094_p9 = scmp.lt.s32.totalorder %s3092_s22, %s3088_s25 }
 0x370   : > { %p3090_p3 = pnand %p3089_p8, %p3696_p11  ;;  %p3095_p5 = por %p3094_p9, %p3093_p4 }
 0x372   : > { %p3091_p13 = pneg %p3090_p3 }
 0x374   : > { %p3096_p10 = pnand %p3095_p5, %p3091_p13 }
 0x3b6   : > { %v1503_v0 = vpop.permute.xlu2 %1502 }
 0x3b7   : > { %v1505_v3 = vmul.f32 %v1503_v0, %v1500_v1 }
 0x3be   : > { %v1507_v2 = vpop.permute.xlu2 %1506 }
 0x3bf   : > { %v1509_v4 = vmul.f32 %v1507_v2, %v1480_v48  ;;  %v1591_v48 = vpop.permute.xlu1 %1590 }
 0x3c1   : > { %v1510_v5 = vadd.f32 %v1509_v4, %v1505_v3 }
 0x3c3   : > { %1512 = vrot.lane.b32.xlu0 %v1510_v5, %s3403_s14  ;;  %s3406_s14 = smov 112  }
 0x3c6   : > { %v1706_v55 = vpop.permute.xlu2 %1705 }
 0x435   : > { %v1513_v8 = vpop.permute.xlu0 %1512 }
 0x436   : > { %1515 = vst.msk [vmem:[#allocation2] sm:$0xff] %vm1411_vm3, %v1513_v8  ;;  %2399 = vmatmul.msk.f32.vlgmr.msrb.gmra.mxu0 %vm1411_vm3, %v1513_v8  ;;  %2402 = vmatmul.msk.f32.vlgmr.msrb.gmra.mxu3 %vm1411_vm3, %v1513_v8 }
 0x437   : > { %1516 = vst.msk [vmem:[%s1262_s8] sm:$0xff] %vm1411_vm3, %v1513_v8 }
 0x4b3   : > { %v1544_v19 = vpop.f32.mrf.mxu0 }
 0x4b4   : > { %v1545_v20 = vadd.f32 %v2664_v18, %v1544_v19 }
 0x4b6   : > { %v1547_v21 = vmax.f32 %v1545_v20, 0.0 }
 0x4b8   : > { %2400 = vmatmul.msk.f32.vlgmr.msrb.gmra.mxu1 %vm1411_vm3, %v1547_v21 }
 0x4b9   : > { %v1654_v24 = vpop.f32.mrf.mxu3 }
 0x4ba   : > { %v1655_v25 = vadd.f32 %v1654_v24, %v1634_v22 }
 0x4bc   : > { %v1661_v26 = vadd.f32 %v2665_v23, %v1655_v25 }
 0x4be   : > { %v1662_v27 = vmax.f32 %v1661_v26, 0.0 }
 0x4c0   : > { %2403 = vmatmul.msk.f32.vlgmr.msra.gmra.mxu0 %vm1411_vm3, %v1662_v27 }
 0x535   : > { %v1576_v29 = vpop.f32.mrf.mxu1 }
 0x536   : > { %v3908_v30 = vadd.f32 %v2666_v28, %v1576_v29 }
 0x538   : > { %v1580_v31 = vand.u32 2147483647, %v3908_v30  ;;  %1599 = vst.msk [vmem:[%s1276_s18] sm:$0xff] %vm1373_vm4, %v3908_v30  ;;  %v1579_v45 = vmax.f32 %v3908_v30, 0.0 }
 0x53a   : > { %v1581_v32 = vsub.f32 0.0, %v1580_v31 }
 0x53c   : > { %v1582_v34 = vmul.f32 1.442695, %v1581_v32 }
 0x53d   : > { %v1691_v35 = vpop.f32.mrf.mxu0 }
 0x53e   : > { %v3916_v36 = vadd.f32 %v2667_v33, %v1691_v35  ;;  %2674 = vpow2.f32 %v1582_v34 }
 0x540   : > { %v1695_v37 = vand.u32 2147483647, %v3916_v36  ;;  %1714 = vst.msk [vmem:[%s1297_s26] sm:$0xff] %vm1373_vm4, %v3916_v36  ;;  %v1694_v52 = vmax.f32 %v3916_v36, 0.0 }
 0x542   : > { %v1696_v38 = vsub.f32 0.0, %v1695_v37 }
 0x544   : > { %v2675_v39 = vpop.eup %2674  ;;  %v1697_v40 = vmul.f32 1.442695, %v1696_v38 }
 0x545   : > { %v1584_v41 = vadd.f32 1.0, %v2675_v39 }
 0x546   : > { %2676 = vpow2.f32 %v1697_v40 }
 0x547   : > { %2678 = vlog2.f32 %v1584_v41 }
 0x54c   : > { %v2677_v42 = vpop.eup %2676 }
 0x54d   : > { %v2679_v43 = vpop.eup %2678  ;;  %v1699_v44 = vadd.f32 1.0, %v2677_v42 }
 0x54e   : > { %v1586_v46 = vmul.f32 0.6931472, %v2679_v43 }
 0x54f   : > { %2680 = vlog2.f32 %v1699_v44 }
 0x550   : > { %v1587_v47 = vadd.f32 %v1586_v46, %v1579_v45 }
 0x552   : > { %v1588_v49 = vadd.f32 0.1, %v1587_v47 }
 0x554   : > { %v1593_v50 = vmul.f32 %v1591_v48, %v1588_v49  ;;  %1601 = vrot.lane.b32.xlu2 %v1588_v49, %s3406_s14 }
 0x555   : > { %v2681_v51 = vpop.eup %2680 }
 0x556   : > { %1595 = vrot.lane.b32.xlu0 %v1593_v50, %s3406_s14  ;;  %v1701_v53 = vmul.f32 0.6931472, %v2681_v51 }
 0x558   : > { %v1702_v54 = vadd.f32 %v1701_v53, %v1694_v52 }
 0x55a   : > { %v1703_v56 = vadd.f32 0.1, %v1702_v54 }
 0x55b   : > { %3099 = shalt.err (!%p3096_p10)
}
 0x55c   : > { %s4198_s26 = sld [smem:[#allocation64_spill]]  ;;  %v1708_v57 = vmul.f32 %v1706_v55, %v1703_v56  ;;  %s1766_s15 = sshll.u32 %s1262_s8, 4  ;;  %s1767_s15 = int_to_ptr.vmem [resolvable:$true] %s1766_s15 }
 0x55d   : > { %2471 = dma.vmem_to_hbm [thread:$0]  (%p3696_p11), %s1842_s28, 128, %s1844_s5, %s4118_s11  }
 0x55e   : > { %1710 = vrot.lane.b32.xlu1 %v1708_v57, %s3406_s14  ;;  %1716 = vrot.lane.b32.xlu0 %v1703_v56, %s3406_s14  ;;  %s1723_s22 = scalar_lea.sflag [#allocation6], %s3826_s20 }
 0x562   : > { %s1764_s24 = scalar_lea.hbm %s4198_s26, %s3926_s27  ;;  %s3120_s28 = scalar_lea.hbm %s4198_s26, 40 }
 0x563   : > { %s1768_s25 = sshll.u32 %s1764_s24, 4  ;;  %s1769_s25 = int_to_ptr.hbm [resolvable:$true] %s1768_s25 }
 0x564   : > { %s3114_s7 = sshra.s32 %s1769_s25, 4  ;;  %s3115_s7 = int_to_ptr.hbm [resolvable:$true] %s3114_s7 }
 0x565   : > { %s3116_s13 = scalar_lea.hbm %s3115_s7, 8  ;;  %p3121_p1 = scmp.lt.s32.totalorder %s3115_s7, %s4198_s26 }
 0x566   : > { %p3117_p6 = scmp.ne.s32.totalorder %s3115_s7, %s3116_s13  ;;  %p3122_p0 = scmp.lt.s32.totalorder %s3120_s28, %s3116_s13 }
 0x568   : > { %p3118_p12 = pnand %p3117_p6, %p3696_p11  ;;  %p3123_p2 = por %p3122_p0, %p3121_p1 }
 0x56a   : > { %p3119_p7 = pneg %p3118_p12 }
 0x56c   : > { %p3124_p8 = pnand %p3123_p2, %p3119_p7 }
 0x56e   : > { %3127 = shalt.err (!%p3124_p8)
}
 0x56f   : > { %s4199_s8 = sld [smem:[#allocation67_spill]]  ;;  %s1811_s14 = sshll.u32 %s1283_s29, 4  ;;  %s1812_s14 = int_to_ptr.vmem [resolvable:$true] %s1811_s14 }
 0x570   : > { %2466 = dma.vmem_to_hbm [thread:$0]  (%p3696_p11), %s1767_s15, 128, %s1769_s25, %s1723_s22  }
 0x571   : > { %s4120_s7 = scalar_lea.sflag [#allocation30], %s3838_s23 }
 0x575   : > { %s1809_s20 = scalar_lea.hbm %s4199_s8, %s3926_s27  ;;  %s3148_s15 = scalar_lea.hbm %s4199_s8, 40 }
 0x576   : > { %s1813_s5 = sshll.u32 %s1809_s20, 4  ;;  %s1814_s5 = int_to_ptr.hbm [resolvable:$true] %s1813_s5 }
 0x577   : > { %s3142_s13 = sshra.s32 %s1814_s5, 4  ;;  %s3143_s13 = int_to_ptr.hbm [resolvable:$true] %s3142_s13 }
 0x578   : > { %s3144_s24 = scalar_lea.hbm %s3143_s13, 8  ;;  %p3149_p9 = scmp.lt.s32.totalorder %s3143_s13, %s4199_s8 }
 0x579   : > { %p3145_p3 = scmp.ne.s32.totalorder %s3143_s13, %s3144_s24  ;;  %p3150_p5 = scmp.lt.s32.totalorder %s3148_s15, %s3144_s24 }
 0x57b   : > { %p3146_p13 = pnand %p3145_p3, %p3696_p11  ;;  %p3151_p10 = por %p3150_p5, %p3149_p9 }
 0x57d   : > { %p3147_p4 = pneg %p3146_p13 }
 0x57f   : > { %p3152_p6 = pnand %p3151_p10, %p3147_p4 }
 0x5ae   : > { %v1602_v58 = vpop.permute.xlu2 %1601 }
 0x5af   : > { %1604 = vst.msk [vmem:[%s1283_s29] sm:$0xff] %vm1373_vm4, %v1602_v58 }
 0x5b0   : > { %3155 = shalt.err (!%p3152_p6)
}
 0x5b1   : > { %s4200_s29 = sld [smem:[#allocation65_spill]]  ;;  %s3978_s24 = sshll.u32 %s1269_s17, 4  ;;  %s1782_s24 = int_to_ptr.vmem [resolvable:$true] %s3978_s24 }
 0x5b2   : > { %s4201_s25 = sld [smem:[#allocation66_spill]]  ;;  %s3984_s11 = sshll.u32 %s1276_s18, 4  ;;  %s1797_s11 = int_to_ptr.vmem [resolvable:$true] %s3984_s11 }
 0x5b3   : > { %s4202_s22 = sld [smem:[#allocation70_spill]]  ;;  %s4204_s18 = scalar_lea.vmem [#allocation34], %s3829_s1 }
 0x5b4   : > { %s4203_s28 = sld [smem:[#allocation68_spill]] }
 0x5b5   : > { %2469 = dma.vmem_to_hbm [thread:$0]  (%p3696_p11), %s1812_s14, 128, %s1814_s5, %s4120_s7  }
 0x5b6   : > { %s1728_s7 = scalar_lea.sflag [#allocation27], %s3838_s23 }
 0x5b7   : > { %s1779_s20 = scalar_lea.hbm %s4200_s29, %s3926_s27  ;;  %s3176_s8 = scalar_lea.hbm %s4200_s29, 40 }
 0x5b8   : > { %s1794_s13 = scalar_lea.hbm %s4201_s25, %s3926_s27  ;;  %s3980_s15 = sshll.u32 %s1779_s20, 4  ;;  %s1784_s15 = int_to_ptr.hbm [resolvable:$true] %s3980_s15 }
 0x5b9   : > { %s3986_s2 = sshll.u32 %s1794_s13, 4  ;;  %s1854_s14 = scalar_lea.hbm %s4202_s22, %s3926_s27  ;;  %s1799_s2 = int_to_ptr.hbm [resolvable:$true] %s3986_s2 }
 0x5ba   : > { %s1824_s5 = scalar_lea.hbm %s4203_s28, %s3926_s27  ;;  %s4002_s20 = sshll.u32 %s4204_s18, 4  ;;  %s1857_s20 = int_to_ptr.vmem [resolvable:$true] %s4002_s20 }
 0x5bb   : > { %s4004_s13 = sshll.u32 %s1854_s14, 4  ;;  %s3170_s3 = sshra.s32 %s1784_s15, 4  ;;  %s3171_s3 = int_to_ptr.hbm [resolvable:$true] %s3170_s3  ;;  %s1859_s13 = int_to_ptr.hbm [resolvable:$true] %s4004_s13 }
 0x5bc   : > { %s3172_s4 = scalar_lea.hbm %s3171_s3, 8  ;;  %p3177_p0 = scmp.lt.s32.totalorder %s3171_s3, %s4200_s29 }
 0x5bd   : > { %p3173_p12 = scmp.ne.s32.totalorder %s3171_s3, %s3172_s4  ;;  %p3178_p2 = scmp.lt.s32.totalorder %s3176_s8, %s3172_s4 }
 0x5bf   : > { %p3174_p7 = pnand %p3173_p12, %p3696_p11  ;;  %p3179_p8 = por %p3178_p2, %p3177_p0 }
 0x5c1   : > { %p3175_p1 = pneg %p3174_p7 }
 0x5c3   : > { %p3180_p3 = pnand %p3179_p8, %p3175_p1 }
 0x5c8   : > { %v1596_v59 = vpop.permute.xlu0 %1595 }
 0x5c9   : > { %v1598_v60 = vadd.f32 %v1596_v59, %v3908_v30 }
 0x5cb   : > { %1605 = vst.msk [vmem:[%s1269_s17] sm:$0xff] %vm1373_vm4, %v1598_v60 }
 0x5cc   : > { %3183 = shalt.err (!%p3180_p3)
}
 0x5cd   : > { %2467 = dma.vmem_to_hbm [thread:$0]  (%p3696_p11), %s1782_s24, 128, %s1784_s15, %s1728_s7  }
 0x5ce   : > { %s3198_s17 = sshra.s32 %s1799_s2, 4  ;;  %s3204_s3 = scalar_lea.hbm %s4201_s25, 40  ;;  %s3199_s17 = int_to_ptr.hbm [resolvable:$true] %s3198_s17 }
 0x5cf   : > { %s3200_s14 = scalar_lea.hbm %s3199_s17, 8  ;;  %p3205_p5 = scmp.lt.s32.totalorder %s3199_s17, %s4201_s25 }
 0x5d0   : > { %p3201_p13 = scmp.ne.s32.totalorder %s3199_s17, %s3200_s14  ;;  %p3206_p10 = scmp.lt.s32.totalorder %s3204_s3, %s3200_s14 }
 0x5d2   : > { %p3202_p4 = pnand %p3201_p13, %p3696_p11  ;;  %p3207_p6 = por %p3206_p10, %p3205_p5 }
 0x5d4   : > { %p3203_p9 = pneg %p3202_p4 }
 0x5d6   : > { %p3208_p12 = pnand %p3207_p6, %p3203_p9 }
 0x5d8   : > { %3211 = shalt.err (!%p3208_p12)
}
 0x5d9   : > { %2468 = dma.vmem_to_hbm [thread:$0]  (%p3696_p11), %s1797_s11, 128, %s1799_s2, %s1728_s7   ;;  %v1717_v61 = vpop.permute.xlu0 %1716  ;;  %v1711_v62 = vpop.permute.xlu1 %1710 }
 0x5da   : > { %s4205_s4 = scalar_lea.vmem [#allocation31], %s3829_s1  ;;  %s4032_s24 = sshll.u32 %s1824_s5, 4  ;;  %v1713_v63 = vadd.f32 %v1711_v62, %v3916_v36  ;;  %s1829_s24 = int_to_ptr.hbm [resolvable:$true] %s4032_s24 }
 0x5db   : > { %s4027_s8 = sshll.u32 %s4205_s4, 4  ;;  %s4206_s15 = smov %s4204_s18  ;;  %s1827_s8 = int_to_ptr.vmem [resolvable:$true] %s4027_s8 }
 0x5dc   : > { %1719 = vst.msk [vmem:[%s4206_s15] sm:$0xff] %vm1373_vm4, %v1717_v61  ;;  %s3226_s2 = sshra.s32 %s1859_s13, 4  ;;  %s3232_s11 = scalar_lea.hbm %s4202_s22, 40  ;;  %s3227_s2 = int_to_ptr.hbm [resolvable:$true] %s3226_s2 }
 0x5dd   : > { %s3228_s27 = scalar_lea.hbm %s3227_s2, 8  ;;  %p3233_p2 = scmp.lt.s32.totalorder %s3227_s2, %s4202_s22 }
 0x5de   : > { %p3229_p7 = scmp.ne.s32.totalorder %s3227_s2, %s3228_s27  ;;  %p3234_p8 = scmp.lt.s32.totalorder %s3232_s11, %s3228_s27 }
 0x5e0   : > { %p3230_p1 = pnand %p3229_p7, %p3696_p11  ;;  %p3235_p3 = por %p3234_p8, %p3233_p2 }
 0x5e2   : > { %p3231_p0 = pneg %p3230_p1 }
 0x5e4   : > { %p3236_p13 = pnand %p3235_p3, %p3231_p0 }
 0x5e6   : > { %3239 = shalt.err (!%p3236_p13)
}
 0x5e7   : > { %s4207_s7 = scalar_lea.sflag [#allocation33], %s3838_s23  ;;  %s4208_s5 = smov %s4205_s4  ;;  %1721 = vst.msk [vmem:[#allocation3] sm:$0xff] %vm1373_vm4, %v1713_v63 }
 0x5e8   : > { %2472 = dma.vmem_to_hbm [thread:$0]  (%p3696_p11), %s1857_s20, 128, %s1859_s13, %s4207_s7   ;;  %1720 = vst.msk [vmem:[%s4208_s5] sm:$0xff] %vm1373_vm4, %v1713_v63 }
 0x5e9   : > { %s3254_s18 = sshra.s32 %s1829_s24, 4  ;;  %s3260_s14 = scalar_lea.hbm %s4203_s28, 40  ;;  %s3255_s18 = int_to_ptr.hbm [resolvable:$true] %s3254_s18 }
 0x5ea   : > { %s3256_s17 = scalar_lea.hbm %s3255_s18, 8  ;;  %p3261_p10 = scmp.lt.s32.totalorder %s3255_s18, %s4203_s28 }
 0x5eb   : > { %p3257_p4 = scmp.ne.s32.totalorder %s3255_s18, %s3256_s17  ;;  %p3262_p6 = scmp.lt.s32.totalorder %s3260_s14, %s3256_s17 }
 0x5ed   : > { %p3258_p9 = pnand %p3257_p4, %p3696_p11  ;;  %p3263_p12 = por %p3262_p6, %p3261_p10 }
 0x5ef   : > { %p3259_p5 = pneg %p3258_p9 }
 0x5f1   : > { %p3264_p7 = pnand %p3263_p12, %p3259_p5 }
 0x5f3   : > { %3267 = shalt.err (!%p3264_p7)
}
 0x5f4   : > { %s4209_s1 = scalar_lea.sflag [#allocation30], %s3838_s23 }
 0x5f5   : > { %2470 = dma.vmem_to_hbm [thread:$0]  (%p3696_p11), %s1827_s8, 128, %s1829_s24, %s4209_s1  }
 0x5f6 PF: > { %s4210_s20 = sld [smem:[#allocation71_spill]]  ;;  %p2564_p1 = scmp.ge.s32.totalorder %s3358_s16, 2 }
 0x5f7   : > { %s4211_s13 = sld [smem:[#allocation76_spill]] }
 0x5fc   : > { %s1870_s3 = sand.u32 1, %s4210_s20  }
 0x5fd   : > { %p4212_p0 = scmp.ne.s32.totalorder %s4211_s13, 0  ;;  %s1871_s4 = scalar_lea.sflag [#allocation6], %s1870_s3 }
 0x5ff   : > { %p2522_p2 = pnand %p2564_p1, %p4212_p0 }
 0x601   : > { %p2523_p8 = pneg %p2522_p2 }
 0x603   : > { %3321 = dma.done.wait (%p2523_p8), %s1871_s4, 128  }
 0x604   : > { %3323 = vsyncadd (%p2523_p8), %s1871_s4, 4294967168  ;;  %s4213_s6 = sadd.s32 4294967294, %s3358_s16  }
 0x605   : > { %s1880_s23 = sand.u32 1, %s4213_s6  }
 0x606   : > { %s1881_s15 = scalar_lea.sflag [#allocation27], %s1880_s23 }
 0x607   : > { %3325 = dma.done.wait (%p2523_p8), %s1881_s15, 256  }
 0x608   : > { %3327 = vsyncadd (%p2523_p8), %s1881_s15, 4294967040  ;;  %s1901_s2 = scalar_lea.sflag [#allocation30], %s1880_s23 }
 0x609   : > { %3329 = dma.done.wait (%p2523_p8), %s1901_s2, 256  }
 0x60a   : > { %3331 = vsyncadd (%p2523_p8), %s1901_s2, 4294967040  ;;  %s1921_s8 = scalar_lea.sflag [#allocation33], %s1880_s23 }
 0x60b   : > { %3333 = dma.done.wait (%p2523_p8), %s1921_s8, 256  }
 0x60c   : > { %3335 = vsyncadd (%p2523_p8), %s1921_s8, 4294967040  ;;  %s93_s16 = sadd.s32 1, %s3358_s16   ;;  %s4214_s24 = sld [smem:[#allocation75_spill]] }
 0x60d   : > { %p90_p11 = scmp.ge.s32.totalorder %s93_s16, 7   ;;  %s4215_s11 = sld [smem:[#allocation73_spill]] }
 0x60e   : > { %s4216_s15 = sld [smem:[#allocation74_spill]]  ;;  %s4217_s7 = smov %s3342_s0 }
 0x60f   : > { %s4218_s0 = smov %s3346_s10  ;;  %92 = sbr.rel (!%p90_p11) target bundleno = 77 (0x4d), region = 360 }
 0x612   : > { %s4219_s10 = smov %s4214_s24 }
 0x614   :  { %1937 = vsyncpa [#allocation5], 1 }
 0x615   :  { %1939 = vsyncpa [#allocation5 + $0x1], 1 }
 0x616   :  { %1940 = vsyncpa [#allocation8], 1 }
 0x617   :  { %1942 = vsyncpa [#allocation8 + $0x1], 1 }
 0x618   :  { %1943 = vsyncpa [#allocation11], 1 }
 0x619   :  { %1944 = vsyncpa [#allocation14], 1 }
 0x61a   :  { %1945 = vsyncpa [#allocation17], 1 }
 0x61b   :  { %1946 = vsyncpa [#allocation20], 1 }
 0x61c   :  { %1947 = vsyncpa [#allocation23], 1 }
 0x61d   :  { %1948 = vsyncpa [#allocation6], 1 }
 0x61e   :  { %1950 = vsyncpa [#allocation6 + $0x1], 1 }
 0x61f   :  { %1951 = vsyncpa [#allocation27], 1 }
 0x620   :  { %1953 = vsyncpa [#allocation27 + $0x1], 1 }
 0x621   :  { %1954 = vsyncpa [#allocation30], 1 }
 0x622   :  { %1956 = vsyncpa [#allocation30 + $0x1], 1 }
 0x623   :  { %1957 = vsyncpa [#allocation33], 1 }
 0x624   :  { %1959 = vsyncpa [#allocation33 + $0x1], 1 }

</bundles_post_ra>
